<compile_context>
chip_gen: v6e
topology: v6e:2x2x1
jax: 0.10.0
libtpu: 0.0.40
codegen_flags: <defaults>
</compile_context>

<pallas_src>
import numpy as np
import jax
import jax.numpy as jnp
from jax.experimental import pallas as pl
from jax.experimental.pallas import tpu as pltpu

VOCAB_SIZE = 32
EMBEDDING_DIM = 128   # original code requires embedding_dim == encode_dim (index_copy)
ENCODE_DIM = 128
BATCH_SIZE = 4

NODE_BUCKET = 128     # node-count bucket; multiples of 128 keep the matmul M-dim MXU/lane
                      # aligned (use 256 multiples if large forests ever become MXU-bound
                      # on v6e/v7x; on v5e 128 is the native tile)
BS_PAD = 8            # sublane-pad the batch dim so the final store is a full (8,128) tile


def _round_up(x, m):
    return ((x + m - 1) // m) * m


# ----------------------------- Pallas kernel -----------------------------

def _forest_encode_kernel(s_ref, bat_ref, floor_ref, proj_ref, out_ref):
    """vals = S @ proj_emb (MXU); out[b] = max( max_{node n of batch b} vals[n], floor[b] )."""
    # One MXU matmul replaces both the per-node gather and the serial bottom-up
    # subtree accumulation of the original recursion.  Padded S rows are all-zero,
    # so no uninitialized / stale data can leak in.
    vals = jnp.dot(s_ref[...], proj_ref[...],
                   preferred_element_type=jnp.float32)        # (n_pad, E)

    bat = bat_ref[...]                                        # (n_pad, 1) int32, -1 = padding
    bs_pad = floor_ref.shape[0]                               # 8 (static)
    neg = jnp.float32(-jnp.inf)

    rows = []
    for b in range(bs_pad):                                   # fixed tiny unroll (8)
        sel = jnp.where(bat == b, vals, neg)                  # VPU select, lane-dense
        rows.append(jnp.max(sel, axis=0, keepdims=True))      # XLU sublane reduction -> (1, E)
    res = jnp.concatenate(rows, axis=0)                       # (bs_pad, E)

    # floor[b] == 0.0 where some node_list level does not cover batch row b
    # (those levels contribute an all-zero row to the stacked max in the original);
    # -inf otherwise (no effect).  Single unmasked full-tile store.
    out_ref[...] = jnp.maximum(res, floor_ref[...])


@jax.jit
def _forest_encode(s, batches_col, floor, proj):
    n_pad, v = s.shape
    bs_pad, e = floor.shape
    return pl.pallas_call(
        _forest_encode_kernel,
        out_shape=jax.ShapeDtypeStruct((bs_pad, e), jnp.float32),
        grid=(1,),
        in_specs=[pl.BlockSpec((n_pad, v), lambda i: (0, 0)),
                  pl.BlockSpec((n_pad, 1), lambda i: (0, 0)),
                  pl.BlockSpec((bs_pad, e), lambda i: (0, 0)),
                  pl.BlockSpec((v, e), lambda i: (0, 0))],
        out_specs=pl.BlockSpec((bs_pad, e), lambda i: (0, 0)),
        compiler_params=pltpu.CompilerParams(
            dimension_semantics=("arbitrary",),
            vmem_limit_bytes=32 * 1024 * 1024),
    )(s, batches_col, floor, proj)


# ----------------------------- Module port -----------------------------

class BatchTreeEncoderPallas:
    """Mirrors BatchTreeEncoder.forward semantics; all dense math in one Pallas kernel."""

    stop = -1

    def __init__(self, vocab_size, embedding_dim, encode_dim, key):
        assert embedding_dim == encode_dim, "original index_copy requires equal dims"
        k_emb, k_wc, k_bc, k_wl, k_wr = jax.random.split(key, 5)
        self.vocab_size = vocab_size
        self.encode_dim = encode_dim
        # deterministic synthetic parameters (no checkpoint)
        self.embedding = 0.1 * jax.random.normal(k_emb, (vocab_size, embedding_dim), jnp.float32)
        # nn.Linear(embedding_dim, encode_dim): y = x @ W^T + b; we store W^T directly.
        self.W_c = 0.1 * jax.random.normal(k_wc, (embedding_dim, encode_dim), jnp.float32)
        self.b_c = 0.1 * jax.random.normal(k_bc, (1, encode_dim), jnp.float32)
        # W_l / W_r / relu are declared in the PyTorch module but never used in forward().
        self.W_l = 0.1 * jax.random.normal(k_wl, (encode_dim, encode_dim), jnp.float32)
        self.W_r = 0.1 * jax.random.normal(k_wr, (encode_dim, encode_dim), jnp.float32)
        # One-shot projected-embedding table (deletes the per-level matmul entirely).
        # Plain XLA dot with HIGHEST precision per review -- no Pallas needed here.
        self.proj_emb = (jnp.dot(self.embedding, self.W_c,
                                 precision=jax.lax.Precision.HIGHEST) + self.b_c)

    # ---- host-side bookkeeping: exact mirror of traverse_mul's index logic ----
    def _collect(self, node, batch_index, parent_gids, rec):
        node_length = len(node)
        if not node_length:
            return None
        index, children_index = [], []
        current_node, children = [], []
        for i in range(node_length):
            if isinstance(node[i], list) and node[i][0] != -1:
                index.append(i)
                current_node.append(node[i][0])
                temp = node[i][1:]
                for j in range(len(temp)):
                    if isinstance(temp[j], list) and temp[j][0] != -1:
                        if len(children_index) <= j:
                            children_index.append([i])
                            children.append([temp[j]])
                        else:
                            children_index[j].append(i)
                            children[j].append(temp[j])
            else:
                batch_index[i] = -1

        # assign global node ids (pre-order: parents get smaller ids than children)
        gid_of = {}
        for k, i in enumerate(index):
            g = len(rec["tokens"])
            gid_of[i] = g
            rec["tokens"].append(current_node[k])
            rec["parents"].append(parent_gids[i])
            rec["batches"].append(batch_index[i])

        for c in range(len(children)):
            batch_children_index = [batch_index[i] for i in children_index[c]]
            child_parents = [gid_of[i] for i in children_index[c]]
            self._collect(children[c], batch_children_index, child_parents, rec)

        # one node_list entry per recursion call; record which batch rows it covers
        rec["entries"].append([b for b in batch_index if b != -1])
        return True

    def forward(self, x, bs):
        rec = {"tokens": [], "parents": [], "batches": [], "entries": []}
        self._collect(x, list(range(bs)), [-1] * len(x), rec)
        tokens, parents, batches = rec["tokens"], rec["parents"], rec["batches"]
        n = len(tokens)
        if n == 0:
            return jnp.zeros((bs, self.encode_dim), jnp.float32)

        n_pad = max(NODE_BUCKET, _round_up(n, NODE_BUCKET))
        bs_pad = max(BS_PAD, _round_up(bs, BS_PAD))

        # S[p, v] = #nodes with token v in the subtree rooted at p  (== D @ onehot,
        # with D the descendant-closure matrix; built directly on the host).
        s = np.zeros((n_pad, self.vocab_size), np.float32)
        for i in range(n):
            a = i
            while a != -1:
                s[a, tokens[i]] += 1.0
                a = parents[a]

        # batch row of each node; -1 for padded rows so they never match any batch.
        batches_col = np.full((n_pad, 1), -1, np.int32)
        for i in range(n):
            batches_col[i, 0] = batches[i]

        # batch row b sees an all-zero row in the stacked node_list iff some recursion
        # level does not cover it -> floor 0.0, else -inf (no effect).
        n_entries = max(len(rec["entries"]), 1)
        cover = [sum(1 for e in rec["entries"] if b in e) for b in range(bs)]
        floor = np.full((bs_pad, self.encode_dim), -np.inf, np.float32)
        for b in range(bs):
            if cover[b] < n_entries:
                floor[b, :] = 0.0
        floor[bs:, :] = 0.0   # padded batch rows (sliced off below)

        out = _forest_encode(jnp.asarray(s), jnp.asarray(batches_col),
                             jnp.asarray(floor), self.proj_emb)
        return out[:bs]


# ------------------- pure-JAX reference (faithful port of the original) -------------------

class _ReferenceBatchTreeEncoder:
    def __init__(self, embedding, W_c_T, b_c, encode_dim):
        self.embedding, self.W, self.b = embedding, W_c_T, b_c
        self.encode_dim = encode_dim

    def traverse_mul(self, node, batch_index):
        node_length = len(node)
        if not node_length:
            return None
        index, children_index = [], []
        current_node, children = [], []
        for i in range(node_length):
            if isinstance(node[i], list) and node[i][0] != -1:
                index.append(i)
                current_node.append(node[i][0])
                temp = node[i][1:]
                for j in range(len(temp)):
                    if isinstance(temp[j], list) and temp[j][0] != -1:
                        if len(children_index) <= j:
                            children_index.append([i]); children.append([temp[j]])
                        else:
                            children_index[j].append(i); children[j].append(temp[j])
            else:
                batch_index[i] = -1
        x = jnp.zeros((node_length, self.encode_dim), jnp.float32)
        if len(index):
            emb = jnp.take(self.embedding, jnp.asarray(current_node, jnp.int32), axis=0)
            x = x.at[jnp.asarray(index, jnp.int32)].set(emb)
        batch_current = jnp.dot(x, self.W, precision=jax.lax.Precision.HIGHEST) + self.b
        for c in range(len(children)):
            batch_children_index = [batch_index[i] for i in children_index[c]]
            tree = self.traverse_mul(children[c], batch_children_index)
            if tree is not None:
                zeros = jnp.zeros((node_length, self.encode_dim), jnp.float32)
                zeros = zeros.at[jnp.asarray(children_index[c], jnp.int32)].set(tree)
                batch_current = batch_current + zeros
        b_in = jnp.asarray([i for i in batch_index if i != -1], jnp.int32)
        self.node_list.append(
            jnp.zeros((self.batch_size, self.encode_dim), jnp.float32).at[b_in].set(batch_current))
        return batch_current

    def forward(self, x, bs):
        self.batch_size = bs
        self.node_list = []
        self.traverse_mul(x, list(range(bs)))
        return jnp.max(jnp.stack(self.node_list), axis=0)


# ----------------------------- main -----------------------------

if __name__ == "__main__":
    key = jax.random.PRNGKey(0)

    # A small deterministic batch of 4 ASTs; node = [token_id, child, child, ...]
    tree0 = [3, [5, [7]], [2]]
    tree1 = [1, [4]]
    tree2 = [6, [2, [9], [10]], [8, [11]]]
    tree3 = [12]
    x_trees = [tree0, tree1, tree2, tree3]

    enc = BatchTreeEncoderPallas(VOCAB_SIZE, EMBEDDING_DIM, ENCODE_DIM, key)
    out = jax.block_until_ready(enc.forward(x_trees, BATCH_SIZE))
    assert out.shape == (BATCH_SIZE, ENCODE_DIM)

    # Faithful pure-JAX port of the original recursion for a correctness check.
    # Tolerance 2e-3 absorbs the MXU f32-pass rounding of the in-kernel matmul vs the
    # HIGHEST-precision reference (values are O(0.3-1.0)).
    ref = _ReferenceBatchTreeEncoder(enc.embedding, enc.W_c, enc.b_c, ENCODE_DIM)
    out_ref = jax.block_until_ready(ref.forward(x_trees, BATCH_SIZE))
    assert jnp.allclose(out, out_ref, atol=2e-3, rtol=2e-3), \
        "Pallas output mismatch vs reference"

    print("KERNEL_OK")
</pallas_src>

<mosaic_0001>
module attributes {stable_mosaic.version = 11 : i64} {
  func.func @_forest_encode_kernel(%arg0: i32, %arg1: memref<128x32xf32, #tpu.memory_space<vmem>>, %arg2: memref<128x1xi32, #tpu.memory_space<vmem>>, %arg3: memref<8x128xf32, #tpu.memory_space<vmem>>, %arg4: memref<32x128xf32, #tpu.memory_space<vmem>>, %arg5: memref<8x128xf32, #tpu.memory_space<vmem>>) attributes {dimension_semantics = [#tpu.dimension_semantics<arbitrary>], iteration_bounds = array<i64: 1>, scalar_prefetch = 0 : i64, scratch_operands = 0 : i64, tpu.core_type = #tpu.core_type<tc>, window_params = [{pipeline_mode = #tpu.pipeline_mode<synchronous>, transform_indices = @transform_0, window_bounds = array<i64: 128, 32>}, {pipeline_mode = #tpu.pipeline_mode<synchronous>, transform_indices = @transform_1, window_bounds = array<i64: 128, 1>}, {pipeline_mode = #tpu.pipeline_mode<synchronous>, transform_indices = @transform_2, window_bounds = array<i64: 8, 128>}, {pipeline_mode = #tpu.pipeline_mode<synchronous>, transform_indices = @transform_3, window_bounds = array<i64: 32, 128>}, {pipeline_mode = #tpu.pipeline_mode<synchronous>, transform_indices = @transform_4, window_bounds = array<i64: 8, 128>}]} {
    %c0 = arith.constant 0 : index
    %c0_0 = arith.constant 0 : index
    %0 = vector.load %arg1[%c0, %c0_0] : memref<128x32xf32, #tpu.memory_space<vmem>>, vector<128x32xf32>
    %c0_1 = arith.constant 0 : index
    %c0_2 = arith.constant 0 : index
    %1 = vector.load %arg4[%c0_1, %c0_2] : memref<32x128xf32, #tpu.memory_space<vmem>>, vector<32x128xf32>
    %cst = arith.constant dense<0.000000e+00> : vector<128x128xf32>
    %2 = tpu.matmul %0, %1, %cst {dimension_numbers = #tpu.dot_dimension_numbers<[1], [0], [0], [1], [0, 0, 1, 1], [], []>} : vector<128x32xf32>, vector<32x128xf32>, vector<128x128xf32> -> vector<128x128xf32>
    %c0_3 = arith.constant 0 : index
    %c0_4 = arith.constant 0 : index
    %3 = vector.load %arg2[%c0_3, %c0_4] : memref<128x1xi32, #tpu.memory_space<vmem>>, vector<128x1xi32>
    %c0_i32 = arith.constant 0 : i32
    %4 = vector.broadcast %c0_i32 : i32 to vector<128x1xi32>
    %5 = arith.cmpi eq, %3, %4 : vector<128x1xi32>
    %cst_5 = arith.constant 0xFF800000 : f32
    %6 = vector.shape_cast %5 : vector<128x1xi1> to vector<128x1xi1>
    %7 = vector.broadcast %6 : vector<128x1xi1> to vector<128x128xi1>
    %8 = vector.broadcast %cst_5 : f32 to vector<128x128xf32>
    %9 = arith.select %7, %2, %8 : vector<128x128xi1>, vector<128x128xf32>
    %cst_6 = arith.constant dense<0xFF800000> : vector<128xf32>
    %10 = vector.multi_reduction <maximumf>, %9, %cst_6 [0] : vector<128x128xf32> to vector<128xf32>
    %11 = vector.shape_cast %10 : vector<128xf32> to vector<1x128xf32>
    %c1_i32 = arith.constant 1 : i32
    %12 = vector.broadcast %c1_i32 : i32 to vector<128x1xi32>
    %13 = arith.cmpi eq, %3, %12 : vector<128x1xi32>
    %cst_7 = arith.constant 0xFF800000 : f32
    %14 = vector.shape_cast %13 : vector<128x1xi1> to vector<128x1xi1>
    %15 = vector.broadcast %14 : vector<128x1xi1> to vector<128x128xi1>
    %16 = vector.broadcast %cst_7 : f32 to vector<128x128xf32>
    %17 = arith.select %15, %2, %16 : vector<128x128xi1>, vector<128x128xf32>
    %cst_8 = arith.constant dense<0xFF800000> : vector<128xf32>
    %18 = vector.multi_reduction <maximumf>, %17, %cst_8 [0] : vector<128x128xf32> to vector<128xf32>
    %19 = vector.shape_cast %18 : vector<128xf32> to vector<1x128xf32>
    %c2_i32 = arith.constant 2 : i32
    %20 = vector.broadcast %c2_i32 : i32 to vector<128x1xi32>
    %21 = arith.cmpi eq, %3, %20 : vector<128x1xi32>
    %cst_9 = arith.constant 0xFF800000 : f32
    %22 = vector.shape_cast %21 : vector<128x1xi1> to vector<128x1xi1>
    %23 = vector.broadcast %22 : vector<128x1xi1> to vector<128x128xi1>
    %24 = vector.broadcast %cst_9 : f32 to vector<128x128xf32>
    %25 = arith.select %23, %2, %24 : vector<128x128xi1>, vector<128x128xf32>
    %cst_10 = arith.constant dense<0xFF800000> : vector<128xf32>
    %26 = vector.multi_reduction <maximumf>, %25, %cst_10 [0] : vector<128x128xf32> to vector<128xf32>
    %27 = vector.shape_cast %26 : vector<128xf32> to vector<1x128xf32>
    %c3_i32 = arith.constant 3 : i32
    %28 = vector.broadcast %c3_i32 : i32 to vector<128x1xi32>
    %29 = arith.cmpi eq, %3, %28 : vector<128x1xi32>
    %cst_11 = arith.constant 0xFF800000 : f32
    %30 = vector.shape_cast %29 : vector<128x1xi1> to vector<128x1xi1>
    %31 = vector.broadcast %30 : vector<128x1xi1> to vector<128x128xi1>
    %32 = vector.broadcast %cst_11 : f32 to vector<128x128xf32>
    %33 = arith.select %31, %2, %32 : vector<128x128xi1>, vector<128x128xf32>
    %cst_12 = arith.constant dense<0xFF800000> : vector<128xf32>
    %34 = vector.multi_reduction <maximumf>, %33, %cst_12 [0] : vector<128x128xf32> to vector<128xf32>
    %35 = vector.shape_cast %34 : vector<128xf32> to vector<1x128xf32>
    %c4_i32 = arith.constant 4 : i32
    %36 = vector.broadcast %c4_i32 : i32 to vector<128x1xi32>
    %37 = arith.cmpi eq, %3, %36 : vector<128x1xi32>
    %cst_13 = arith.constant 0xFF800000 : f32
    %38 = vector.shape_cast %37 : vector<128x1xi1> to vector<128x1xi1>
    %39 = vector.broadcast %38 : vector<128x1xi1> to vector<128x128xi1>
    %40 = vector.broadcast %cst_13 : f32 to vector<128x128xf32>
    %41 = arith.select %39, %2, %40 : vector<128x128xi1>, vector<128x128xf32>
    %cst_14 = arith.constant dense<0xFF800000> : vector<128xf32>
    %42 = vector.multi_reduction <maximumf>, %41, %cst_14 [0] : vector<128x128xf32> to vector<128xf32>
    %43 = vector.shape_cast %42 : vector<128xf32> to vector<1x128xf32>
    %c5_i32 = arith.constant 5 : i32
    %44 = vector.broadcast %c5_i32 : i32 to vector<128x1xi32>
    %45 = arith.cmpi eq, %3, %44 : vector<128x1xi32>
    %cst_15 = arith.constant 0xFF800000 : f32
    %46 = vector.shape_cast %45 : vector<128x1xi1> to vector<128x1xi1>
    %47 = vector.broadcast %46 : vector<128x1xi1> to vector<128x128xi1>
    %48 = vector.broadcast %cst_15 : f32 to vector<128x128xf32>
    %49 = arith.select %47, %2, %48 : vector<128x128xi1>, vector<128x128xf32>
    %cst_16 = arith.constant dense<0xFF800000> : vector<128xf32>
    %50 = vector.multi_reduction <maximumf>, %49, %cst_16 [0] : vector<128x128xf32> to vector<128xf32>
    %51 = vector.shape_cast %50 : vector<128xf32> to vector<1x128xf32>
    %c6_i32 = arith.constant 6 : i32
    %52 = vector.broadcast %c6_i32 : i32 to vector<128x1xi32>
    %53 = arith.cmpi eq, %3, %52 : vector<128x1xi32>
    %cst_17 = arith.constant 0xFF800000 : f32
    %54 = vector.shape_cast %53 : vector<128x1xi1> to vector<128x1xi1>
    %55 = vector.broadcast %54 : vector<128x1xi1> to vector<128x128xi1>
    %56 = vector.broadcast %cst_17 : f32 to vector<128x128xf32>
    %57 = arith.select %55, %2, %56 : vector<128x128xi1>, vector<128x128xf32>
    %cst_18 = arith.constant dense<0xFF800000> : vector<128xf32>
    %58 = vector.multi_reduction <maximumf>, %57, %cst_18 [0] : vector<128x128xf32> to vector<128xf32>
    %59 = vector.shape_cast %58 : vector<128xf32> to vector<1x128xf32>
    %c7_i32 = arith.constant 7 : i32
    %60 = vector.broadcast %c7_i32 : i32 to vector<128x1xi32>
    %61 = arith.cmpi eq, %3, %60 : vector<128x1xi32>
    %cst_19 = arith.constant 0xFF800000 : f32
    %62 = vector.shape_cast %61 : vector<128x1xi1> to vector<128x1xi1>
    %63 = vector.broadcast %62 : vector<128x1xi1> to vector<128x128xi1>
    %64 = vector.broadcast %cst_19 : f32 to vector<128x128xf32>
    %65 = arith.select %63, %2, %64 : vector<128x128xi1>, vector<128x128xf32>
    %cst_20 = arith.constant dense<0xFF800000> : vector<128xf32>
    %66 = vector.multi_reduction <maximumf>, %65, %cst_20 [0] : vector<128x128xf32> to vector<128xf32>
    %67 = vector.shape_cast %66 : vector<128xf32> to vector<1x128xf32>
    %68 = tpu.concatenate %11, %19, %27, %35, %43, %51, %59, %67 in 0 : vector<1x128xf32>, vector<1x128xf32>, vector<1x128xf32>, vector<1x128xf32>, vector<1x128xf32>, vector<1x128xf32>, vector<1x128xf32>, vector<1x128xf32> -> vector<8x128xf32>
    %c0_21 = arith.constant 0 : index
    %c0_22 = arith.constant 0 : index
    %69 = vector.load %arg3[%c0_21, %c0_22] : memref<8x128xf32, #tpu.memory_space<vmem>>, vector<8x128xf32>
    %70 = arith.maximumf %68, %69 : vector<8x128xf32>
    %c0_23 = arith.constant 0 : index
    %c0_24 = arith.constant 0 : index
    %71 = vector.load %arg5[%c0_23, %c0_24] : memref<8x128xf32, #tpu.memory_space<vmem>>, vector<8x128xf32>
    tpu.vector_store %arg5[%c0_23, %c0_24], %70 {strides = array<i32>} : memref<8x128xf32, #tpu.memory_space<vmem>>, vector<8x128xf32>,
    return
  }
  func.func @transform_0(%arg0: i32) -> (i32, i32) {
    %c0_i32 = arith.constant 0 : i32
    %c0_i32_0 = arith.constant 0 : i32
    %c0_i32_1 = arith.constant 0 : i32
    return %c0_i32, %c0_i32_0 : i32, i32
  }
  func.func @transform_1(%arg0: i32) -> (i32, i32) {
    %c0_i32 = arith.constant 0 : i32
    %c0_i32_0 = arith.constant 0 : i32
    %c0_i32_1 = arith.constant 0 : i32
    return %c0_i32, %c0_i32_0 : i32, i32
  }
  func.func @transform_2(%arg0: i32) -> (i32, i32) {
    %c0_i32 = arith.constant 0 : i32
    %c0_i32_0 = arith.constant 0 : i32
    %c0_i32_1 = arith.constant 0 : i32
    return %c0_i32, %c0_i32_0 : i32, i32
  }
  func.func @transform_3(%arg0: i32) -> (i32, i32) {
    %c0_i32 = arith.constant 0 : i32
    %c0_i32_0 = arith.constant 0 : i32
    %c0_i32_1 = arith.constant 0 : i32
    return %c0_i32, %c0_i32_0 : i32, i32
  }
  func.func @transform_4(%arg0: i32) -> (i32, i32) {
    %c0_i32 = arith.constant 0 : i32
    %c0_i32_0 = arith.constant 0 : i32
    %c0_i32_1 = arith.constant 0 : i32
    return %c0_i32, %c0_i32_0 : i32, i32
  }
}

</mosaic_0001>

<bundles_post_ra>
// kernel: _forest_encode.1
= control target key start
LH: loop header
LB: loop body
LE: loop exit
PB: predicated region body
PF: predicated region fallthrough
CT: control target
= control target key end

     0   :  { %v2432_v4 = vmov 0   ;;  %vm38_vm6 = vcmask 261120   ;;  %s2427_s0 = inlined_call_operand.vmem [shape: f32[128,32], index: 0, kind: input, shape index: {}]   ;;  %s2428_s1 = inlined_call_operand.vmem [shape: s32[128,1], index: 1, kind: input, shape index: {}]   ;;  %s2429_s2 = inlined_call_operand.vmem [shape: f32[8,128], index: 2, kind: input, shape index: {}]   ;;  %s2430_s3 = inlined_call_operand.vmem [shape: f32[32,128], index: 3, kind: input, shape index: {}]   ;;  %s2431_s4 = inlined_call_operand.hbm [shape: f32[8,128], index: 4, kind: output, shape index: {}]  }
   0x1   :  { %v37_v0 = vld [vmem:[%s2430_s3 + $0x18] sm:$0xff]  ;;  %v1484_v1 = vld [vmem:[%s2428_s1 + $0x10] sm:$0xff]  ;;  %v1489_v2 = vld [vmem:[%s2428_s1] sm:$0xff]  ;;  %1422 = vset.pattern.permute.xlu1 %v2432_v4  ;;  %1421 = vset.pattern.permute.xlu0 %v2432_v4 }
   0x2   :  { %1379 = vmatprep.subr.mxu0 %v37_v0  ;;  %1411 = vmatprep.subr.mxu1 %v37_v0  ;;  %vm250_vm0 = vcmp.eq.s32.totalorder %v1484_v1, 0  ;;  %vm248_vm1 = vcmp.eq.s32.totalorder %v1489_v2, 0  ;;  %v1496_v3 = vld [vmem:[%s2428_s1 + $0x18] sm:$0xff]  ;;  %v36_v7 = vld [vmem:[%s2430_s3 + $0x10] sm:$0xff]  ;;  %v1508_v8 = vld [vmem:[%s2428_s1 + $0x8] sm:$0xff] }
   0x3   :  { %v266_v5 = vsel %vm250_vm0, 1, %v2432_v4  ;;  %v264_v6 = vsel %vm248_vm1, 1, %v2432_v4  ;;  %1380 = vmatpush3.msra.mxu0 %v37_v0  ;;  %1415 = vmatpush3.msra.mxu1 %v37_v0  ;;  %vm251_vm2 = vcmp.eq.s32.totalorder %v1496_v3, 0  ;;  %vm249_vm3 = vcmp.eq.s32.totalorder %v1508_v8, 0  ;;  %v35_v9 = vld [vmem:[%s2430_s3 + $0x8] sm:$0xff]  ;;  %v1523_v11 = vld [vmem:[%s2428_s1 + $0x20] sm:$0xff] }
   0x4   :  { %287 = vperm.xlu1 %1422, %v266_v5   ;;  %281 = vperm.xlu0 %1421, %v264_v6   ;;  %v1518_v10 = vld [vmem:[%s2428_s1 + $0x28] sm:$0xff]  ;;  %v267_v12 = vsel %vm251_vm2, 1, %v2432_v4  ;;  %v265_v13 = vsel %vm249_vm3, 1, %v2432_v4  ;;  %v34_v14 = vld [vmem:[%s2430_s3] sm:$0xff]  ;;  %vm252_vm5 = vcmp.eq.s32.totalorder %v1523_v11, 0  ;;  %v1541_v17 = vld [vmem:[%s2428_s1 + $0x38] sm:$0xff] }
   0x5   :  { %1381 = vmatprep.subr.mxu0 %v36_v7  ;;  %1412 = vmatprep.subr.mxu1 %v36_v7  ;;  %v18_v15 = vld [vmem:[%s2427_s0] sm:$0xff]  ;;  %vm253_vm4 = vcmp.eq.s32.totalorder %v1518_v10, 0  ;;  %v1546_v18 = vld [vmem:[%s2428_s1 + $0x30] sm:$0xff]  ;;  %v19_v19 = vld [vmem:[%s2427_s0 + $0x8] sm:$0xff]  ;;  %v268_v22 = vsel %vm252_vm5, 1, %v2432_v4  ;;  %vm255_vm7 = vcmp.eq.s32.totalorder %v1541_v17, 0 }
   0x6   :  { %1382 = vmatpush3.msra.mxu0 %v36_v7  ;;  %1416 = vmatpush3.msra.mxu1 %v36_v7  ;;  %v26_v16 = vld [vmem:[%s2427_s0 + $0x40] sm:$0xff]  ;;  %v27_v20 = vld [vmem:[%s2427_s0 + $0x48] sm:$0xff]  ;;  %v269_v21 = vsel %vm253_vm4, 1, %v2432_v4  ;;  %v20_v23 = vld [vmem:[%s2427_s0 + $0x10] sm:$0xff]  ;;  %vm254_vm8 = vcmp.eq.s32.totalorder %v1546_v18, 0 }
   0x7   :  { %1383 = vmatprep.subr.mxu0 %v35_v9  ;;  %1413 = vmatprep.subr.mxu1 %v35_v9  ;;  %v28_v24 = vld [vmem:[%s2427_s0 + $0x50] sm:$0xff] }
   0x8   :  { %1384 = vmatpush3.msra.mxu0 %v35_v9  ;;  %1417 = vmatpush3.msra.mxu1 %v35_v9 }
   0x9   :  { %290 = vperm.xlu1 %1422, %v267_v12   ;;  %284 = vperm.xlu0 %1421, %v265_v13  }
   0xa   :  { %1385 = vmatprep.subr.mxu0 %v34_v14  ;;  %1414 = vmatprep.subr.mxu1 %v34_v14 }
   0xb   :  { %1386 = vmatpush3.msra.mxu0 %v34_v14  ;;  %1418 = vmatpush3.msra.mxu1 %v34_v14 }
   0xc   :  { %1387 = vmatprep.mubr.msk.f32.mxu0 %vm38_vm6, %v18_v15  ;;  %1399 = vmatprep.mubr.msk.f32.mxu1 %vm38_vm6, %v26_v16 }
   0xd   :  { %9 = vsyncpa [#allocation3], 0  ;;  %1388 = vmatmul.mubr.msk.f32.vlgmr.msra.gmra.mxu0 %vm38_vm6, %v19_v19  ;;  %1400 = vmatmul.mubr.msk.f32.vlgmr.msra.gmra.mxu1 %vm38_vm6, %v27_v20  ;;  %v1571_v25 = vld [vmem:[%s2428_s1 + $0x48] sm:$0xff]  ;;  %v1576_v26 = vld [vmem:[%s2428_s1 + $0x40] sm:$0xff]  ;;  %v271_v29 = vsel %vm255_vm7, 1, %v2432_v4  ;;  %v270_v30 = vsel %vm254_vm8, 1, %v2432_v4 }
   0xe   :  { %296 = vperm.xlu1 %1422, %v269_v21   ;;  %293 = vperm.xlu0 %1421, %v268_v22   ;;  %v21_v27 = vld [vmem:[%s2427_s0 + $0x18] sm:$0xff]  ;;  %v22_v31 = vld [vmem:[%s2427_s0 + $0x20] sm:$0xff]  ;;  %vm257_vm9 = vcmp.eq.s32.totalorder %v1571_v25, 0  ;;  %vm256_vm10 = vcmp.eq.s32.totalorder %v1576_v26, 0  ;;  %v1606_v34 = vld [vmem:[%s2428_s1 + $0x50] sm:$0xff]  ;;  %vm382_vm1 = vcmp.eq.s32.totalorder %v1508_v8, 1 }
   0xf   :  { %v29_v28 = vld [vmem:[%s2427_s0 + $0x58] sm:$0xff]  ;;  %1390 = vmatprep.mubr.msk.f32.mxu0 %vm38_vm6, %v20_v23  ;;  %1402 = vmatprep.mubr.msk.f32.mxu1 %vm38_vm6, %v28_v24  ;;  %v30_v32 = vld [vmem:[%s2427_s0 + $0x60] sm:$0xff]  ;;  %v23_v35 = vld [vmem:[%s2427_s0 + $0x28] sm:$0xff]  ;;  %v273_v37 = vsel %vm257_vm9, 1, %v2432_v4  ;;  %v272_v38 = vsel %vm256_vm10, 1, %v2432_v4  ;;  %vm258_vm12 = vcmp.eq.s32.totalorder %v1606_v34, 0 }
  0x10   :  { %v1601_v33 = vld [vmem:[%s2428_s1 + $0x58] sm:$0xff]  ;;  %v31_v36 = vld [vmem:[%s2427_s0 + $0x68] sm:$0xff]  ;;  %v24_v39 = vld [vmem:[%s2427_s0 + $0x30] sm:$0xff]  ;;  %v274_v46 = vsel %vm258_vm12, 1, %v2432_v4  ;;  %vm381_vm2 = vcmp.eq.s32.totalorder %v1489_v2, 1  ;;  %v398_v53 = vsel %vm382_vm1, 1, %v2432_v4 }
  0x11   :  { %1391 = vmatmul.mubr.msk.f32.gmra.mxu0 %vm38_vm6, %v21_v27  ;;  %1403 = vmatmul.mubr.msk.f32.gmra.mxu1 %vm38_vm6, %v29_v28  ;;  %v32_v40 = vld [vmem:[%s2427_s0 + $0x70] sm:$0xff]  ;;  %vm259_vm11 = vcmp.eq.s32.totalorder %v1601_v33, 0  ;;  %v1631_v41 = vld [vmem:[%s2428_s1 + $0x68] sm:$0xff]  ;;  %v1636_v42 = vld [vmem:[%s2428_s1 + $0x60] sm:$0xff]  ;;  %v397_v54 = vsel %vm381_vm2, 1, %v2432_v4  ;;  %vm384_vm3 = vcmp.eq.s32.totalorder %v1496_v3, 1 }
  0x12   :  { %302 = vperm.xlu1 %1422, %v271_v29   ;;  %299 = vperm.xlu0 %1421, %v270_v30   ;;  %v25_v43 = vld [vmem:[%s2427_s0 + $0x38] sm:$0xff]  ;;  %v275_v45 = vsel %vm259_vm11, 1, %v2432_v4  ;;  %vm261_vm13 = vcmp.eq.s32.totalorder %v1631_v41, 0  ;;  %vm260_vm14 = vcmp.eq.s32.totalorder %v1636_v42, 0  ;;  %v1660_v48 = vld [vmem:[%s2428_s1 + $0x70] sm:$0xff]  ;;  %vm383_vm4 = vcmp.eq.s32.totalorder %v1484_v1, 1 }
  0x13   :  { %1393 = vmatprep.mubr.msk.f32.mxu0 %vm38_vm6, %v22_v31  ;;  %1405 = vmatprep.mubr.msk.f32.mxu1 %vm38_vm6, %v30_v32  ;;  %v33_v44 = vld [vmem:[%s2427_s0 + $0x78] sm:$0xff]  ;;  %v277_v49 = vsel %vm261_vm13, 1, %v2432_v4  ;;  %v276_v50 = vsel %vm260_vm14, 1, %v2432_v4  ;;  %vm262_vm0 = vcmp.eq.s32.totalorder %v1660_v48, 0  ;;  %v400_v55 = vsel %vm384_vm3, 1, %v2432_v4  ;;  %s1452_s18 = smov [#allocation2]  }
  0x14   :  { %v1655_v47 = vld [vmem:[%s2428_s1 + $0x78] sm:$0xff]  ;;  %v278_v52 = vsel %vm262_vm0, 1, %v2432_v4  ;;  %v399_v56 = vsel %vm383_vm4, 1, %v2432_v4  ;;  %vm386_vm5 = vcmp.eq.s32.totalorder %v1518_v10, 1  ;;  %vm388_vm7 = vcmp.eq.s32.totalorder %v1541_v17, 1  ;;  %s1335_s19 = sshll.u32 %s1452_s18, 4  ;;  %s1336_s19 = int_to_ptr.vmem [resolvable:$true] %s1335_s19 }
  0x15   :  { %1394 = vmatmul.mubr.msk.f32.gmra.mxu0 %vm38_vm6, %v23_v35  ;;  %1406 = vmatmul.mubr.msk.f32.gmra.mxu1 %vm38_vm6, %v31_v36  ;;  %vm263_vm15 = vcmp.eq.s32.totalorder %v1655_v47, 0  ;;  %v402_v57 = vsel %vm386_vm5, 1, %v2432_v4  ;;  %vm387_vm8 = vcmp.eq.s32.totalorder %v1546_v18, 1  ;;  %v404_v59 = vsel %vm388_vm7, 1, %v2432_v4  ;;  %s1429_s20 = scalar_lea.vmem %s1336_s19, 128  ;;  %p1434_p1 = scmp.lt.s32.totalorder %s1336_s19, %s1336_s19 }
  0x16   :  { %308 = vperm.xlu1 %1422, %v273_v37   ;;  %305 = vperm.xlu0 %1421, %v272_v38   ;;  %v279_v51 = vsel %vm263_vm15, 1, %v2432_v4  ;;  %v403_v60 = vsel %vm387_vm8, 1, %v2432_v4  ;;  %vm390_vm9 = vcmp.eq.s32.totalorder %v1571_v25, 1  ;;  %vm389_vm10 = vcmp.eq.s32.totalorder %v1576_v26, 1  ;;  %p1430_p0 = scmp.ne.s32.totalorder %s1336_s19, %s1429_s20  ;;  %p1435_p2 = scmp.lt.s32.totalorder %s1429_s20, %s1429_s20 }
  0x17   :  { %1396 = vmatprep.mubr.msk.f32.mxu0 %vm38_vm6, %v24_v39  ;;  %1408 = vmatprep.mubr.msk.f32.mxu1 %vm38_vm6, %v32_v40  ;;  %v406_v61 = vsel %vm390_vm9, 1, %v2432_v4  ;;  %v405_v62 = vsel %vm389_vm10, 1, %v2432_v4  ;;  %vm392_vm11 = vcmp.eq.s32.totalorder %v1601_v33, 1  ;;  %vm391_vm12 = vcmp.eq.s32.totalorder %v1606_v34, 1 }
  0x18   :  { %v408_v63 = vsel %vm392_vm11, 1, %v2432_v4  ;;  %v407_v0 = vsel %vm391_vm12, 1, %v2432_v4  ;;  %vm394_vm13 = vcmp.eq.s32.totalorder %v1631_v41, 1  ;;  %vm393_vm14 = vcmp.eq.s32.totalorder %v1636_v42, 1  ;;  %p1436_p3 = por %p1435_p2, %p1434_p1 }
  0x19   :  { %1397 = vmatmul.mubr.msk.f32.gmra.mxu0 %vm38_vm6, %v25_v43  ;;  %1409 = vmatmul.mubr.msk.f32.gmra.mxu1 %vm38_vm6, %v33_v44  ;;  %vm385_vm6 = vcmp.eq.s32.totalorder %v1523_v11, 1  ;;  %v410_v5 = vsel %vm394_vm13, 1, %v2432_v4  ;;  %v409_v6 = vsel %vm393_vm14, 1, %v2432_v4  ;;  %vm396_vm15 = vcmp.eq.s32.totalorder %v1655_v47, 1 }
  0x1a   :  { %314 = vperm.xlu1 %1422, %v275_v45   ;;  %311 = vperm.xlu0 %1421, %v274_v46   ;;  %v401_v58 = vsel %vm385_vm6, 1, %v2432_v4  ;;  %vm395_vm0 = vcmp.eq.s32.totalorder %v1660_v48, 1  ;;  %v412_v7 = vsel %vm396_vm15, 1, %v2432_v4  ;;  %vm515_vm1 = vcmp.eq.s32.totalorder %v1508_v8, 2  ;;  %p1437_p4 = pnand %p1436_p3, %p1430_p0 }
  0x1b   :  { %v411_v9 = vsel %vm395_vm0, 1, %v2432_v4  ;;  %vm514_vm2 = vcmp.eq.s32.totalorder %v1489_v2, 2  ;;  %v531_v12 = vsel %vm515_vm1, 1, %v2432_v4  ;;  %vm517_vm3 = vcmp.eq.s32.totalorder %v1496_v3, 2 }
  0x1c   :  { %v530_v13 = vsel %vm514_vm2, 1, %v2432_v4  ;;  %vm516_vm4 = vcmp.eq.s32.totalorder %v1484_v1, 2  ;;  %v533_v14 = vsel %vm517_vm3, 1, %v2432_v4  ;;  %vm519_vm5 = vcmp.eq.s32.totalorder %v1518_v10, 2 }
  0x1d   :  { %v532_v15 = vsel %vm516_vm4, 1, %v2432_v4  ;;  %vm518_vm6 = vcmp.eq.s32.totalorder %v1523_v11, 2  ;;  %v535_v16 = vsel %vm519_vm5, 1, %v2432_v4  ;;  %vm521_vm7 = vcmp.eq.s32.totalorder %v1541_v17, 2 }
  0x1e   :  { %320 = vperm.xlu1 %1422, %v277_v49   ;;  %317 = vperm.xlu0 %1421, %v276_v50   ;;  %v534_v19 = vsel %vm518_vm6, 1, %v2432_v4  ;;  %vm520_vm8 = vcmp.eq.s32.totalorder %v1546_v18, 2  ;;  %v537_v20 = vsel %vm521_vm7, 1, %v2432_v4  ;;  %vm523_vm9 = vcmp.eq.s32.totalorder %v1571_v25, 2 }
  0x1f   :  { %v536_v21 = vsel %vm520_vm8, 1, %v2432_v4  ;;  %vm522_vm10 = vcmp.eq.s32.totalorder %v1576_v26, 2  ;;  %v539_v22 = vsel %vm523_vm9, 1, %v2432_v4  ;;  %vm525_vm11 = vcmp.eq.s32.totalorder %v1601_v33, 2 }
  0x20   :  { %v538_v23 = vsel %vm522_vm10, 1, %v2432_v4  ;;  %vm524_vm12 = vcmp.eq.s32.totalorder %v1606_v34, 2  ;;  %v541_v24 = vsel %vm525_vm11, 1, %v2432_v4  ;;  %vm527_vm13 = vcmp.eq.s32.totalorder %v1631_v41, 2 }
  0x21   :  { %v540_v27 = vsel %vm524_vm12, 1, %v2432_v4  ;;  %vm526_vm14 = vcmp.eq.s32.totalorder %v1636_v42, 2  ;;  %v543_v28 = vsel %vm527_vm13, 1, %v2432_v4  ;;  %vm529_vm15 = vcmp.eq.s32.totalorder %v1655_v47, 2 }
  0x22   :  { %326 = vperm.xlu1 %1422, %v279_v51   ;;  %323 = vperm.xlu0 %1421, %v278_v52   ;;  %v542_v29 = vsel %vm526_vm14, 1, %v2432_v4  ;;  %vm528_vm0 = vcmp.eq.s32.totalorder %v1660_v48, 2  ;;  %v545_v30 = vsel %vm529_vm15, 1, %v2432_v4  ;;  %vm648_vm1 = vcmp.eq.s32.totalorder %v1508_v8, 3 }
  0x23   :  { %v544_v31 = vsel %vm528_vm0, 1, %v2432_v4  ;;  %vm647_vm2 = vcmp.eq.s32.totalorder %v1489_v2, 3  ;;  %v664_v32 = vsel %vm648_vm1, 1, %v2432_v4  ;;  %vm650_vm3 = vcmp.eq.s32.totalorder %v1496_v3, 3 }
  0x24   :  { %v663_v35 = vsel %vm647_vm2, 1, %v2432_v4  ;;  %vm649_vm4 = vcmp.eq.s32.totalorder %v1484_v1, 3  ;;  %v666_v36 = vsel %vm650_vm3, 1, %v2432_v4  ;;  %vm652_vm5 = vcmp.eq.s32.totalorder %v1518_v10, 3 }
  0x25   :  { %v665_v37 = vsel %vm649_vm4, 1, %v2432_v4  ;;  %vm651_vm6 = vcmp.eq.s32.totalorder %v1523_v11, 3  ;;  %v668_v38 = vsel %vm652_vm5, 1, %v2432_v4  ;;  %vm654_vm7 = vcmp.eq.s32.totalorder %v1541_v17, 3 }
  0x26   :  { %417 = vperm.xlu1 %1422, %v398_v53   ;;  %414 = vperm.xlu0 %1421, %v397_v54   ;;  %v667_v39 = vsel %vm651_vm6, 1, %v2432_v4  ;;  %vm653_vm8 = vcmp.eq.s32.totalorder %v1546_v18, 3  ;;  %v670_v40 = vsel %vm654_vm7, 1, %v2432_v4  ;;  %vm656_vm9 = vcmp.eq.s32.totalorder %v1571_v25, 3 }
  0x27   :  { %v669_v43 = vsel %vm653_vm8, 1, %v2432_v4  ;;  %vm655_vm10 = vcmp.eq.s32.totalorder %v1576_v26, 3  ;;  %v672_v44 = vsel %vm656_vm9, 1, %v2432_v4  ;;  %vm658_vm11 = vcmp.eq.s32.totalorder %v1601_v33, 3 }
  0x28   :  { %v671_v45 = vsel %vm655_vm10, 1, %v2432_v4  ;;  %vm657_vm12 = vcmp.eq.s32.totalorder %v1606_v34, 3  ;;  %v674_v46 = vsel %vm658_vm11, 1, %v2432_v4  ;;  %vm660_vm13 = vcmp.eq.s32.totalorder %v1631_v41, 3 }
  0x29   :  { %v673_v49 = vsel %vm657_vm12, 1, %v2432_v4  ;;  %vm659_vm14 = vcmp.eq.s32.totalorder %v1636_v42, 3  ;;  %v676_v50 = vsel %vm660_vm13, 1, %v2432_v4  ;;  %vm662_vm15 = vcmp.eq.s32.totalorder %v1655_v47, 3 }
  0x2a   :  { %423 = vperm.xlu1 %1422, %v400_v55   ;;  %420 = vperm.xlu0 %1421, %v399_v56   ;;  %v675_v51 = vsel %vm659_vm14, 1, %v2432_v4  ;;  %vm661_vm0 = vcmp.eq.s32.totalorder %v1660_v48, 3  ;;  %v678_v54 = vsel %vm662_vm15, 1, %v2432_v4  ;;  %vm781_vm1 = vcmp.eq.s32.totalorder %v1508_v8, 4 }
  0x2b   :  { %v677_v55 = vsel %vm661_vm0, 1, %v2432_v4  ;;  %vm780_vm2 = vcmp.eq.s32.totalorder %v1489_v2, 4  ;;  %v797_v56 = vsel %vm781_vm1, 1, %v2432_v4  ;;  %vm783_vm3 = vcmp.eq.s32.totalorder %v1496_v3, 4 }
  0x2c   :  { %vm782_vm4 = vcmp.eq.s32.totalorder %v1484_v1, 4  ;;  %vm785_vm5 = vcmp.eq.s32.totalorder %v1518_v10, 4  ;;  %vm784_vm6 = vcmp.eq.s32.totalorder %v1523_v11, 4  ;;  %vm787_vm7 = vcmp.eq.s32.totalorder %v1541_v17, 4 }
  0x2d   :  { %vm786_vm8 = vcmp.eq.s32.totalorder %v1546_v18, 4  ;;  %vm789_vm9 = vcmp.eq.s32.totalorder %v1571_v25, 4  ;;  %vm788_vm10 = vcmp.eq.s32.totalorder %v1576_v26, 4  ;;  %vm791_vm11 = vcmp.eq.s32.totalorder %v1601_v33, 4 }
  0x2e   :  { %429 = vperm.xlu1 %1422, %v402_v57   ;;  %426 = vperm.xlu0 %1421, %v401_v58   ;;  %v796_v57 = vsel %vm780_vm2, 1, %v2432_v4  ;;  %vm790_vm12 = vcmp.eq.s32.totalorder %v1606_v34, 4  ;;  %vm793_vm13 = vcmp.eq.s32.totalorder %v1631_v41, 4  ;;  %vm792_vm14 = vcmp.eq.s32.totalorder %v1636_v42, 4 }
  0x2f   :  { %vm795_vm15 = vcmp.eq.s32.totalorder %v1655_v47, 4  ;;  %vm794_vm0 = vcmp.eq.s32.totalorder %v1660_v48, 4  ;;  %vm914_vm1 = vcmp.eq.s32.totalorder %v1508_v8, 5  ;;  %vm913_vm2 = vcmp.eq.s32.totalorder %v1489_v2, 5 }
  0x32   :  { %435 = vperm.xlu1 %1422, %v404_v59   ;;  %432 = vperm.xlu0 %1421, %v403_v60   ;;  %v799_v60 = vsel %vm783_vm3, 1, %v2432_v4  ;;  %vm916_vm3 = vcmp.eq.s32.totalorder %v1496_v3, 5 }
  0x36   :  { %441 = vperm.xlu1 %1422, %v406_v61   ;;  %438 = vperm.xlu0 %1421, %v405_v62   ;;  %v798_v61 = vsel %vm782_vm4, 1, %v2432_v4  ;;  %vm915_vm4 = vcmp.eq.s32.totalorder %v1484_v1, 5 }
  0x3a   :  { %447 = vperm.xlu1 %1422, %v408_v63   ;;  %444 = vperm.xlu0 %1421, %v407_v0   ;;  %v801_v0 = vsel %vm785_vm5, 1, %v2432_v4  ;;  %vm918_vm5 = vcmp.eq.s32.totalorder %v1518_v10, 5 }
  0x3e   :  { %453 = vperm.xlu1 %1422, %v410_v5   ;;  %450 = vperm.xlu0 %1421, %v409_v6   ;;  %v800_v5 = vsel %vm784_vm6, 1, %v2432_v4  ;;  %vm917_vm6 = vcmp.eq.s32.totalorder %v1523_v11, 5 }
  0x42   :  { %459 = vperm.xlu1 %1422, %v412_v7   ;;  %456 = vperm.xlu0 %1421, %v411_v9   ;;  %v803_v9 = vsel %vm787_vm7, 1, %v2432_v4  ;;  %vm920_vm7 = vcmp.eq.s32.totalorder %v1541_v17, 5 }
  0x46   :  { %550 = vperm.xlu1 %1422, %v531_v12   ;;  %547 = vperm.xlu0 %1421, %v530_v13   ;;  %v802_v12 = vsel %vm786_vm8, 1, %v2432_v4  ;;  %vm919_vm8 = vcmp.eq.s32.totalorder %v1546_v18, 5 }
  0x4a   :  { %556 = vperm.xlu1 %1422, %v533_v14   ;;  %553 = vperm.xlu0 %1421, %v532_v15   ;;  %v805_v15 = vsel %vm789_vm9, 1, %v2432_v4  ;;  %vm922_vm9 = vcmp.eq.s32.totalorder %v1571_v25, 5 }
  0x4e   :  { %562 = vperm.xlu1 %1422, %v535_v16   ;;  %559 = vperm.xlu0 %1421, %v534_v19   ;;  %v804_v16 = vsel %vm788_vm10, 1, %v2432_v4  ;;  %vm921_vm10 = vcmp.eq.s32.totalorder %v1576_v26, 5 }
  0x52   :  { %568 = vperm.xlu1 %1422, %v537_v20   ;;  %565 = vperm.xlu0 %1421, %v536_v21   ;;  %v807_v21 = vsel %vm791_vm11, 1, %v2432_v4  ;;  %vm924_vm11 = vcmp.eq.s32.totalorder %v1601_v33, 5 }
  0x56   :  { %574 = vperm.xlu1 %1422, %v539_v22   ;;  %571 = vperm.xlu0 %1421, %v538_v23   ;;  %v806_v22 = vsel %vm790_vm12, 1, %v2432_v4  ;;  %vm923_vm12 = vcmp.eq.s32.totalorder %v1606_v34, 5 }
  0x5a   :  { %580 = vperm.xlu1 %1422, %v541_v24   ;;  %577 = vperm.xlu0 %1421, %v540_v27   ;;  %v809_v27 = vsel %vm793_vm13, 1, %v2432_v4  ;;  %vm926_vm13 = vcmp.eq.s32.totalorder %v1631_v41, 5 }
  0x5e   :  { %586 = vperm.xlu1 %1422, %v543_v28   ;;  %583 = vperm.xlu0 %1421, %v542_v29   ;;  %v808_v28 = vsel %vm792_vm14, 1, %v2432_v4  ;;  %vm925_vm14 = vcmp.eq.s32.totalorder %v1636_v42, 5 }
  0x62   :  { %592 = vperm.xlu1 %1422, %v545_v30   ;;  %589 = vperm.xlu0 %1421, %v544_v31   ;;  %v811_v31 = vsel %vm795_vm15, 1, %v2432_v4  ;;  %vm928_vm15 = vcmp.eq.s32.totalorder %v1655_v47, 5 }
  0x63   :  { %v944_v41 = vsel %vm928_vm15, 1, %v2432_v4  ;;  %vm1184_vm15 = vcmp.eq.s32.totalorder %v1518_v10, 7 }
  0x66   :  { %683 = vperm.xlu1 %1422, %v664_v32   ;;  %680 = vperm.xlu0 %1421, %v663_v35   ;;  %v810_v32 = vsel %vm794_vm0, 1, %v2432_v4  ;;  %vm927_vm0 = vcmp.eq.s32.totalorder %v1660_v48, 5 }
  0x67   :  { %v943_v42 = vsel %vm927_vm0, 1, %v2432_v4  ;;  %vm1183_vm0 = vcmp.eq.s32.totalorder %v1523_v11, 7 }
  0x6a   :  { %689 = vperm.xlu1 %1422, %v666_v36   ;;  %686 = vperm.xlu0 %1421, %v665_v37   ;;  %v930_v37 = vsel %vm914_vm1, 1, %v2432_v4  ;;  %vm1047_vm1 = vcmp.eq.s32.totalorder %v1508_v8, 6 }
  0x6e   :  { %695 = vperm.xlu1 %1422, %v668_v38   ;;  %692 = vperm.xlu0 %1421, %v667_v39   ;;  %v929_v38 = vsel %vm913_vm2, 1, %v2432_v4  ;;  %vm1046_vm2 = vcmp.eq.s32.totalorder %v1489_v2, 6 }
  0x72   :  { %701 = vperm.xlu1 %1422, %v670_v40   ;;  %698 = vperm.xlu0 %1421, %v669_v43   ;;  %v932_v43 = vsel %vm916_vm3, 1, %v2432_v4  ;;  %vm1049_vm3 = vcmp.eq.s32.totalorder %v1496_v3, 6 }
  0x76   :  { %707 = vperm.xlu1 %1422, %v672_v44   ;;  %704 = vperm.xlu0 %1421, %v671_v45   ;;  %v931_v44 = vsel %vm915_vm4, 1, %v2432_v4  ;;  %vm1048_vm4 = vcmp.eq.s32.totalorder %v1484_v1, 6 }
  0x7a   :  { %713 = vperm.xlu1 %1422, %v674_v46   ;;  %710 = vperm.xlu0 %1421, %v673_v49   ;;  %v934_v49 = vsel %vm918_vm5, 1, %v2432_v4  ;;  %vm1051_vm5 = vcmp.eq.s32.totalorder %v1518_v10, 6 }
  0x7e   :  { %719 = vperm.xlu1 %1422, %v676_v50   ;;  %716 = vperm.xlu0 %1421, %v675_v51   ;;  %v933_v50 = vsel %vm917_vm6, 1, %v2432_v4  ;;  %vm1050_vm6 = vcmp.eq.s32.totalorder %v1523_v11, 6 }
  0x7f   :  { %v1762_v52 = vpop.permute.xlu1 %287  ;;  %v1764_v53 = vpop.permute.xlu0 %281 }
  0x82   :  { %725 = vperm.xlu1 %1422, %v678_v54   ;;  %722 = vperm.xlu0 %1421, %v677_v55   ;;  %v936_v55 = vsel %vm920_vm7, 1, %v2432_v4  ;;  %vm1053_vm7 = vcmp.eq.s32.totalorder %v1541_v17, 6 }
  0x84   :  { %v1772_v58 = vpop.permute.xlu1 %290  ;;  %v1774_v59 = vpop.permute.xlu0 %284 }
  0x86   :  { %816 = vperm.xlu1 %1422, %v797_v56   ;;  %813 = vperm.xlu0 %1421, %v796_v57   ;;  %v935_v56 = vsel %vm919_vm8, 1, %v2432_v4  ;;  %vm1052_vm8 = vcmp.eq.s32.totalorder %v1546_v18, 6 }
  0x89   :  { %v1782_v62 = vpop.permute.xlu1 %296  ;;  %v1784_v63 = vpop.permute.xlu0 %293 }
  0x8a   :  { %822 = vperm.xlu1 %1422, %v799_v60   ;;  %819 = vperm.xlu0 %1421, %v798_v61   ;;  %v938_v61 = vsel %vm922_vm9, 1, %v2432_v4  ;;  %vm1055_vm9 = vcmp.eq.s32.totalorder %v1571_v25, 6 }
  0x8d   :  { %v1790_v6 = vpop.permute.xlu1 %302  ;;  %v1792_v7 = vpop.permute.xlu0 %299 }
  0x8e   :  { %828 = vperm.xlu1 %1422, %v801_v0   ;;  %825 = vperm.xlu0 %1421, %v800_v5   ;;  %v937_v0 = vsel %vm921_vm10, 1, %v2432_v4  ;;  %vm1054_vm10 = vcmp.eq.s32.totalorder %v1576_v26, 6 }
  0x91   :  { %v1798_v13 = vpop.permute.xlu1 %308  ;;  %v1800_v14 = vpop.permute.xlu0 %305 }
  0x92   :  { %834 = vperm.xlu1 %1422, %v803_v9   ;;  %831 = vperm.xlu0 %1421, %v802_v12   ;;  %v940_v12 = vsel %vm924_vm11, 1, %v2432_v4  ;;  %vm1180_vm11 = vcmp.eq.s32.totalorder %v1508_v8, 7 }
  0x95   :  { %v1806_v19 = vpop.permute.xlu1 %314  ;;  %v1808_v20 = vpop.permute.xlu0 %311 }
  0x96   :  { %840 = vperm.xlu1 %1422, %v805_v15   ;;  %837 = vperm.xlu0 %1421, %v804_v16   ;;  %v939_v15 = vsel %vm923_vm12, 1, %v2432_v4  ;;  %vm1179_vm12 = vcmp.eq.s32.totalorder %v1489_v2, 7  ;;  %v1939_v2 = vsel %vm1180_vm11, 1, %v2432_v4  ;;  %vm337_vm11 = vcmp.eq.s32.totalorder %v1798_v13, 1 }
  0x97   :  { %v1942_v8 = vsel %vm1179_vm12, 1, %v2432_v4  ;;  %vm336_vm12 = vcmp.eq.s32.totalorder %v1800_v14, 1 }
  0x99   :  { %v1814_v23 = vpop.permute.xlu1 %320  ;;  %v1816_v24 = vpop.permute.xlu0 %317 }
  0x9a   :  { %846 = vperm.xlu1 %1422, %v807_v21   ;;  %843 = vperm.xlu0 %1421, %v806_v22   ;;  %v942_v22 = vsel %vm926_vm13, 1, %v2432_v4  ;;  %vm1182_vm13 = vcmp.eq.s32.totalorder %v1496_v3, 7 }
  0x9b   :  { %v1951_v10 = vsel %vm1182_vm13, 1, %v2432_v4  ;;  %vm340_vm13 = vcmp.eq.s32.totalorder %v1816_v24, 1 }
  0x9d   :  { %v1822_v29 = vpop.permute.xlu1 %326  ;;  %v1824_v30 = vpop.permute.xlu0 %323 }
  0x9e   :  { %852 = vperm.xlu1 %1422, %v809_v27   ;;  %849 = vperm.xlu0 %1421, %v808_v28   ;;  %v941_v27 = vsel %vm925_vm14, 1, %v2432_v4  ;;  %vm1181_vm14 = vcmp.eq.s32.totalorder %v1484_v1, 7 }
  0x9f   :  { %v1954_v11 = vsel %vm1181_vm14, 1, %v2432_v4 }
  0xa1   :  { %v1830_v35 = vpop.permute.xlu1 %417  ;;  %v1832_v36 = vpop.permute.xlu0 %414 }
  0xa2   :  { %858 = vperm.xlu1 %1422, %v811_v31   ;;  %855 = vperm.xlu0 %1421, %v810_v32   ;;  %v1063_v32 = vsel %vm1047_vm1, 1, %v2432_v4  ;;  %vm1186_vm1 = vcmp.eq.s32.totalorder %v1541_v17, 7 }
  0xa5   :  { %v1838_v39 = vpop.permute.xlu1 %423  ;;  %v1840_v40 = vpop.permute.xlu0 %420 }
  0xa6   :  { %949 = vperm.xlu1 %1422, %v930_v37   ;;  %946 = vperm.xlu0 %1421, %v929_v38   ;;  %v1062_v37 = vsel %vm1046_vm2, 1, %v2432_v4  ;;  %v1065_v38 = vsel %vm1049_vm3, 1, %v2432_v4  ;;  %vm1185_vm2 = vcmp.eq.s32.totalorder %v1546_v18, 7  ;;  %vm1057_vm3 = vcmp.eq.s32.totalorder %v1601_v33, 6 }
  0xa9   :  { %v1846_v45 = vpop.permute.xlu1 %429  ;;  %v1848_v46 = vpop.permute.xlu0 %426 }
  0xaa   :  { %955 = vperm.xlu1 %1422, %v932_v43   ;;  %952 = vperm.xlu0 %1421, %v931_v44   ;;  %v1064_v43 = vsel %vm1048_vm4, 1, %v2432_v4  ;;  %v1067_v44 = vsel %vm1051_vm5, 1, %v2432_v4  ;;  %vm1056_vm4 = vcmp.eq.s32.totalorder %v1606_v34, 6  ;;  %vm1188_vm5 = vcmp.eq.s32.totalorder %v1571_v25, 7 }
  0xab   :  { %v1987_v17 = vsel %vm1188_vm5, 1, %v2432_v4 }
  0xac   :  { %2447 = vst [vmem:[#allocation8_spill] sm:$0xff] %v1987_v17 }
  0xad   :  { %v1854_v51 = vpop.permute.xlu1 %435  ;;  %v1856_v54 = vpop.permute.xlu0 %432 }
  0xae   :  { %961 = vperm.xlu1 %1422, %v934_v49   ;;  %958 = vperm.xlu0 %1421, %v933_v50   ;;  %v1066_v49 = vsel %vm1050_vm6, 1, %v2432_v4  ;;  %v1913_v50 = vsel %vm1053_vm7, 1, %v2432_v4  ;;  %vm1187_vm6 = vcmp.eq.s32.totalorder %v1576_v26, 7  ;;  %vm328_vm7 = vcmp.eq.s32.totalorder %v1764_v53, 1 }
  0xaf   :  { %v1992_v18 = vsel %vm1187_vm6, 1, %v2432_v4 }
  0xb0   :  { %2448 = vst [vmem:[#allocation9_spill] sm:$0xff] %v1992_v18 }
  0xb1   :  { %v1862_v57 = vpop.permute.xlu1 %441  ;;  %v1864_v60 = vpop.permute.xlu0 %438 }
  0xb2   :  { %967 = vperm.xlu1 %1422, %v936_v55   ;;  %964 = vperm.xlu0 %1421, %v935_v56   ;;  %v1916_v55 = vsel %vm1052_vm8, 1, %v2432_v4  ;;  %vm470_vm5 = vcmp.eq.s32.totalorder %v1862_v57, 1  ;;  %vm469_vm6 = vcmp.eq.s32.totalorder %v1864_v60, 1 }
  0xb5   :  { %v1870_v5 = vpop.permute.xlu1 %447  ;;  %v1872_v9 = vpop.permute.xlu0 %444 }
  0xb6   :  { %973 = vperm.xlu1 %1422, %v938_v61   ;;  %970 = vperm.xlu0 %1421, %v937_v0   ;;  %v1923_v0 = vsel %vm1055_vm9, 1, %v2432_v4  ;;  %vm335_vm9 = vcmp.eq.s32.totalorder %v1790_v6, 1 }
  0xb9   :  { %v1878_v16 = vpop.permute.xlu1 %453  ;;  %v1880_v21 = vpop.permute.xlu0 %450 }
  0xba   :  { %979 = vperm.xlu1 %1422, %v940_v12   ;;  %976 = vperm.xlu0 %1421, %v939_v15   ;;  %v1926_v12 = vsel %vm1054_vm10, 1, %v2432_v4  ;;  %v1957_v15 = vsel %vm1184_vm15, 1, %v2432_v4  ;;  %vm329_vm10 = vcmp.eq.s32.totalorder %v1774_v59, 1 }
  0xbd   :  { %v1886_v28 = vpop.permute.xlu1 %459  ;;  %v1888_v31 = vpop.permute.xlu0 %456 }
  0xbe   :  { %985 = vperm.xlu1 %1422, %v942_v22   ;;  %982 = vperm.xlu0 %1421, %v941_v27   ;;  %v1960_v22 = vsel %vm1183_vm0, 1, %v2432_v4  ;;  %v1965_v27 = vsel %vm1186_vm1, 1, %v2432_v4  ;;  %vm462_vm0 = vcmp.eq.s32.totalorder %v1830_v35, 1  ;;  %vm461_vm1 = vcmp.eq.s32.totalorder %v1832_v36, 1 }
  0xc1   :  { %v1896_v47 = vpop.permute.xlu1 %550  ;;  %v1898_v48 = vpop.permute.xlu0 %547 }
  0xc2   :  { %991 = vperm.xlu1 %1422, %v944_v41   ;;  %988 = vperm.xlu0 %1421, %v943_v42   ;;  %v1970_v41 = vsel %vm1185_vm2, 1, %v2432_v4  ;;  %v1975_v42 = vsel %vm1057_vm3, 1, %v2432_v4  ;;  %vm472_vm3 = vcmp.eq.s32.totalorder %v1870_v5, 1  ;;  %vm595_vm2 = vcmp.eq.s32.totalorder %v1896_v47, 1 }
  0xc3   :  { %2444 = vst [vmem:[#allocation5_spill] sm:$0xff] %v1970_v41  ;;  %2445 = vst [vmem:[#allocation6_spill] sm:$0xff] %v1975_v42  ;;  %vm594_vm8 = vcmp.eq.s32.totalorder %v1898_v48, 1 }
  0xc5   :  { %v1918_v56 = vpop.permute.xlu1 %556  ;;  %v1920_v61 = vpop.permute.xlu0 %553 }
  0xc6   :  { %1082 = vperm.xlu1 %1422, %v1063_v32   ;;  %1079 = vperm.xlu0 %1421, %v1062_v37   ;;  %v1980_v32 = vsel %vm1056_vm4, 1, %v2432_v4  ;;  %vm597_vm15 = vcmp.eq.s32.totalorder %v1918_v56, 1  ;;  %vm596_vm14 = vcmp.eq.s32.totalorder %v1920_v61, 1  ;;  %vm468_vm4 = vcmp.eq.s32.totalorder %v1854_v51, 1 }
  0xc7   :  { %2446 = vst [vmem:[#allocation7_spill] sm:$0xff] %v1980_v32 }
  0xc9   :  { %v1946_v1 = vpop.permute.xlu1 %562  ;;  %v1948_v3 = vpop.permute.xlu0 %559 }
  0xca   :  { %1088 = vperm.xlu1 %1422, %v1065_v38   ;;  %1085 = vperm.xlu0 %1421, %v1064_v43  }
  0xcd   :  { %v2004_v25 = vpop.f32.mrf.mxu0  ;;  %v2006_v26 = vpop.f32.mrf.mxu1 }
  0xce   :  { %2449 = vst [vmem:[#allocation10_spill] sm:$0xff] %v2004_v25  ;;  %2450 = vst [vmem:[#allocation11_spill] sm:$0xff] %v2006_v26  ;;  %v2012_v33 = vpop.permute.xlu1 %568  ;;  %v2014_v34 = vpop.permute.xlu0 %565  ;;  %1094 = vperm.xlu1 %1422, %v1067_v44   ;;  %1091 = vperm.xlu0 %1421, %v1066_v49   ;;  %v345_v43 = vsel %vm329_vm10, %v2004_v25, -inf  ;;  %v478_v47 = vsel %vm462_vm0, %v2004_v25, -inf  ;;  %v353_v44 = vsel %vm337_vm11, %v2006_v26, -inf  ;;  %v486_v49 = vsel %vm470_vm5, %v2006_v26, -inf }
  0xcf   :  { %v2023_v37 = vpop.f32.mrf.mxu0  ;;  %v2025_v38 = vpop.f32.mrf.mxu1  ;;  %v2050_v18 = vsel %vm595_vm2, %v2004_v25, -inf  ;;  %vm473_vm10 = vcmp.eq.s32.totalorder %v1880_v21, 1  ;;  %vm2454_vm11 = vcmp.eq.s32.totalorder %v1772_v58, 1  ;;  %vm599_vm2 = vcmp.eq.s32.totalorder %v1946_v1, 1 }
  0xd0   :  { %2451 = vst [vmem:[#allocation12_spill] sm:$0xff] %v2023_v37  ;;  %2452 = vst [vmem:[#allocation13_spill] sm:$0xff] %v2025_v38  ;;  %v2056_v35 = vsel %vm328_vm7, %v2023_v37, -inf  ;;  %v2061_v13 = vsel %vm461_vm1, %v2023_v37, -inf  ;;  %v2066_v57 = vsel %vm336_vm12, %v2025_v38, -inf  ;;  %v2071_v17 = vsel %vm469_vm6, %v2025_v38, -inf }
  0xd1   :  { %v2045_v59 = vpop.f32.mrf.mxu0  ;;  %v2047_v4 = vpop.f32.mrf.mxu1  ;;  %vm343_vm7 = vcmp.eq.s32.totalorder %v1822_v29, 1  ;;  %v2088_v60 = vsel %vm594_vm8, %v2023_v37, -inf  ;;  %vm476_vm1 = vcmp.eq.s32.totalorder %v1886_v28, 1  ;;  %vm2455_vm5 = vcmp.eq.s32.totalorder %v1838_v39, 1 }
  0xd2   :  { %2453 = vst [vmem:[#allocation14_spill] sm:$0xff] %v2045_v59  ;;  %v575_v32 = vpop.permute.xlu1 %574  ;;  %v572_v42 = vpop.permute.xlu0 %571  ;;  %1100 = vperm.xlu1 %1422, %v1913_v50   ;;  %1097 = vperm.xlu0 %1421, %v1916_v55   ;;  %v2079_v53 = vsel %vm2454_vm11, %v2045_v59, -inf  ;;  %v2095_v58 = vsel %vm2455_vm5, %v2045_v59, -inf  ;;  %vm2456_vm6 = vcmp.eq.s32.totalorder %v1806_v19, 1  ;;  %v2105_v48 = vsel %vm472_vm3, %v2047_v4, -inf }
  0xd3   :  { %vm603_vm12 = vcmp.eq.s32.totalorder %v575_v32, 1  ;;  %vm602_vm0 = vcmp.eq.s32.totalorder %v572_v42, 1  ;;  %v2081_v14 = vpop.f32.mrf.mxu0  ;;  %v2083_v36 = vpop.f32.mrf.mxu1  ;;  %v2100_v50 = vsel %vm2456_vm6, %v2047_v4, -inf  ;;  %v2110_v55 = vsel %vm597_vm15, %v2045_v59, -inf }
  0xd4   :  { %vm598_vm8 = vcmp.eq.s32.totalorder %v1948_v3, 1  ;;  %v2114_v39 = vsel %vm603_vm12, %v2006_v26, -inf  ;;  %v2117_v42 = vsel %vm602_vm0, %v2025_v38, -inf  ;;  %vm2457_vm3 = vcmp.eq.s32.totalorder %v1762_v52, 1 }
  0xd5   :  { %v2119_v19 = vpop.f32.mrf.mxu0  ;;  %v2121_v32 = vpop.f32.mrf.mxu1  ;;  %v2126_v5 = vsel %vm2457_vm3, %v2081_v14, -inf  ;;  %vm2458_vm15 = vcmp.eq.s32.totalorder %v1840_v40, 1  ;;  %vm334_vm11 = vcmp.eq.s32.totalorder %v1792_v7, 1  ;;  %vm2459_vm0 = vcmp.eq.s32.totalorder %v1782_v62, 1 }
  0xd6   :  { %v2131_v56 = vsel %vm2458_vm15, %v2081_v14, -inf  ;;  %v349_v38 = vsel %vm2459_vm0, %v2119_v19, -inf  ;;  %vm2460_vm5 = vcmp.eq.s32.totalorder %v1846_v45, 1  ;;  %v581_v52 = vpop.permute.xlu1 %580  ;;  %v2141_v59 = vpop.permute.xlu0 %577  ;;  %1106 = vperm.xlu1 %1422, %v1923_v0   ;;  %1103 = vperm.xlu0 %1421, %v1926_v12   ;;  %vm2461_vm6 = vcmp.eq.s32.totalorder %v1808_v20, 1 }
  0xd7   :  { %v482_v26 = vsel %vm2460_vm5, %v2119_v19, -inf  ;;  %v2148_v40 = vsel %vm2461_vm6, %v2083_v36, -inf  ;;  %vm2462_vm3 = vcmp.eq.s32.totalorder %v1872_v9, 1  ;;  %v361_v37 = vmax.f32 %v345_v43, %v349_v38  ;;  %v2155_v25 = vpop.f32.mrf.mxu0  ;;  %v2157_v41 = vpop.f32.mrf.mxu1 }
  0xd8   :  { %v2153_v62 = vsel %vm2462_vm3, %v2083_v36, -inf  ;;  %v494_v45 = vmax.f32 %v478_v47, %v482_v26  ;;  %vm605_vm15 = vcmp.eq.s32.totalorder %v581_v52, 1  ;;  %v2162_v0 = vsel %vm596_vm14, %v2081_v14, -inf }
  0xd9   :  { %vm342_vm0 = vcmp.eq.s32.totalorder %v1824_v30, 1  ;;  %vm2463_vm5 = vcmp.eq.s32.totalorder %v1814_v23, 1  ;;  %vm2464_vm6 = vcmp.eq.s32.totalorder %v1878_v16, 1  ;;  %vm2465_vm3 = vcmp.eq.s32.totalorder %v1784_v63, 1  ;;  %v2183_v47 = vpop.f32.mrf.mxu0  ;;  %v2185_v16 = vpop.f32.mrf.mxu1 }
  0xda   :  { %v357_v20 = vsel %vm2463_vm5, %v2121_v32, -inf  ;;  %v2171_v9 = vsel %vm2464_vm6, %v2121_v32, -inf  ;;  %v348_v12 = vsel %vm2465_vm3, %v2155_v25, -inf  ;;  %vm2466_vm12 = vcmp.eq.s32.totalorder %v1848_v46, 1  ;;  %1215 = vperm.xlu1 %1422, %v1939_v2   ;;  %1212 = vperm.xlu0 %1421, %v1942_v8  }
  0xdb   :  { %v481_v61 = vsel %vm2466_vm12, %v2155_v25, -inf  ;;  %v365_v26 = vmax.f32 %v361_v37, %v353_v44  ;;  %v2179_v38 = vmax.f32 %v494_v45, %v486_v49  ;;  %v360_v43 = vmax.f32 %v2056_v35, %v348_v12  ;;  %v587_v49 = vpop.permute.xlu1 %586  ;;  %v584_v35 = vpop.permute.xlu0 %583 }
  0xdc   :  { %v493_v23 = vmax.f32 %v2061_v13, %v481_v61  ;;  %vm475_vm14 = vcmp.eq.s32.totalorder %v1888_v31, 1  ;;  %v2190_v63 = vsel %vm605_vm15, %v2047_v4, -inf  ;;  %v356_v46 = vsel %vm340_vm13, %v2157_v41, -inf }
  0xdd   :  { %v351_v37 = vsel %vm335_vm9, %v2183_v47, -inf  ;;  %v484_v44 = vsel %vm468_vm4, %v2183_v47, -inf  ;;  %vm601_vm12 = vcmp.eq.s32.totalorder %v2012_v33, 1  ;;  %v369_v13 = vmax.f32 %v365_v26, %v357_v20  ;;  %v2216_v20 = vpop.f32.mrf.mxu0 }
  0xde   :  { %v364_v24 = vmax.f32 %v360_v43, %v2066_v57  ;;  %v489_v6 = vsel %vm473_vm10, %v2157_v41, -inf  ;;  %v497_v52 = vmax.f32 %v493_v23, %v2071_v17  ;;  %v502_v51 = vmax.f32 %v2179_v38, %v2171_v9  ;;  %1221 = vperm.xlu1 %1422, %v1951_v10   ;;  %1218 = vperm.xlu0 %1421, %v1954_v11  }
  0xdf   :  { %v363_v45 = vmax.f32 %v2079_v53, %v351_v37  ;;  %v496_v2 = vmax.f32 %v2095_v58, %v484_v44  ;;  %v359_v8 = vsel %vm343_vm7, %v2185_v16, -inf  ;;  %vm600_vm9 = vcmp.eq.s32.totalorder %v2014_v34, 1  ;;  %v2226_v53 = vpop.f32.mrf.mxu1  ;;  %v593_v12 = vpop.permute.xlu1 %592 }
  0xe0   :  { %vm604_vm13 = vcmp.eq.s32.totalorder %v2141_v59, 1  ;;  %v368_v21 = vmax.f32 %v364_v24, %v356_v46  ;;  %v492_v17 = vsel %vm476_vm1, %v2185_v16, -inf  ;;  %vm607_vm4 = vcmp.eq.s32.totalorder %v587_v49, 1  ;;  %v590_v61 = vpop.permute.xlu0 %589  ;;  %v2470_v59 = vld [vmem:[#allocation12_spill] sm:$0xff] }
  0xe1   :  { %v615_v57 = vsel %vm599_vm2, %v2119_v19, -inf  ;;  %v501_v29 = vmax.f32 %v497_v52, %v489_v6  ;;  %vm606_vm10 = vcmp.eq.s32.totalorder %v584_v35, 1  ;;  %v614_v9 = vsel %vm598_vm8, %v2155_v25, -inf }
  0xe2   :  { %v627_v58 = vmax.f32 %v2050_v18, %v615_v57  ;;  %v623_v28 = vsel %vm607_vm4, %v2121_v32, -inf  ;;  %v626_v1 = vmax.f32 %v2088_v60, %v614_v9  ;;  %v350_v26 = vsel %vm334_vm11, %v2216_v20, -inf  ;;  %1227 = vperm.xlu1 %1422, %v1957_v15   ;;  %1224 = vperm.xlu0 %1421, %v1960_v22  }
  0xe3   :  { %vm2467_vm7 = vcmp.eq.s32.totalorder %v1856_v54, 1  ;;  %v622_v38 = vsel %vm606_vm10, %v2157_v41, -inf  ;;  %v362_v10 = vmax.f32 %v2126_v5, %v350_v26  ;;  %v358_v60 = vsel %vm342_vm0, %v2226_v53, -inf  ;;  %v684_v44 = vpop.permute.xlu1 %683 }
  0xe4   :  { %v483_v18 = vsel %vm2467_vm7, %v2216_v20, -inf  ;;  %v631_v3 = vmax.f32 %v627_v58, %v2114_v39  ;;  %v630_v43 = vmax.f32 %v626_v1, %v2117_v42  ;;  %v367_v7 = vmax.f32 %v363_v45, %v2100_v50  ;;  %v681_v5 = vpop.permute.xlu0 %680  ;;  %v1423_v42 = vld [vmem:[%s2428_s1 + $0x58] sm:$0xff] }
  0xe5   :  { %v495_v11 = vmax.f32 %v2131_v56, %v483_v18  ;;  %v372_v23 = vmax.f32 %v368_v21, %v369_v13  ;;  %v366_v54 = vmax.f32 %v362_v10, %v2148_v40  ;;  %v500_v37 = vmax.f32 %v496_v2, %v2105_v48  ;;  %v1424_v48 = vld [vmem:[%s2428_s1 + $0x50] sm:$0xff]  ;;  %v2472_v18 = vld [vmem:[#allocation7_spill] sm:$0xff] }
  0xe6   :  { %v635_v46 = vmax.f32 %v631_v3, %v623_v28  ;;  %vm1190_vm1 = vcmp.eq.s32.totalorder %v1423_v42, 7  ;;  %v634_v30 = vmax.f32 %v630_v43, %v622_v38  ;;  %v371_v56 = vmax.f32 %v367_v7, %v359_v8  ;;  %1233 = vperm.xlu1 %1422, %v1965_v27   ;;  %v2469_v27 = vld [vmem:[#allocation10_spill] sm:$0xff]  ;;  %v2476_v42 = vld [vmem:[#allocation9_spill] sm:$0xff] }
  0xe7   :  { %v499_v39 = vmax.f32 %v495_v11, %v2153_v62  ;;  %v491_v50 = vsel %vm475_vm14, %v2226_v53, -inf  ;;  %vm609_vm2 = vcmp.eq.s32.totalorder %v593_v12, 1  ;;  %vm1189_vm8 = vcmp.eq.s32.totalorder %v1424_v48, 7  ;;  %v690_v45 = vpop.permute.xlu1 %689  ;;  %v1426_v48 = vld [vmem:[%s2428_s1 + $0x60] sm:$0xff] }
  0xe8   :  { %v370_v15 = vmax.f32 %v366_v54, %v358_v60  ;;  %v504_v62 = vmax.f32 %v500_v37, %v492_v17  ;;  %v617_v49 = vsel %vm601_vm12, %v2183_v47, -inf  ;;  %v638_v35 = vmax.f32 %v634_v30, %v635_v46  ;;  %v687_v2 = vpop.permute.xlu0 %686  ;;  %v2474_v37 = vld [vmem:[#allocation14_spill] sm:$0xff] }
  0xe9   :  { %v503_v40 = vmax.f32 %v499_v39, %v491_v50  ;;  %v505_v13 = vmax.f32 %v501_v29, %v502_v51  ;;  %v629_v31 = vmax.f32 %v2110_v55, %v617_v49  ;;  %vm608_vm11 = vcmp.eq.s32.totalorder %v590_v61, 1  ;;  %v2468_v55 = vld [vmem:[#allocation5_spill] sm:$0xff]  ;;  %v2471_v61 = vld [vmem:[#allocation6_spill] sm:$0xff] }
  0xea   :  { %v373_v24 = vmax.f32 %v370_v15, %v371_v56  ;;  %v625_v22 = vsel %vm609_vm2, %v2185_v16, -inf  ;;  %v616_v52 = vsel %vm600_vm9, %v2216_v20, -inf  ;;  %vm728_vm15 = vcmp.eq.s32.totalorder %v684_v44, 1  ;;  %1230 = vperm.xlu0 %1421, %v2468_v55   ;;  %1112 = vperm.xlu1 %1422, %v2471_v61   ;;  %v2475_v56 = vld [vmem:[#allocation8_spill] sm:$0xff]  ;;  %v2477_v55 = vld [vmem:[#allocation11_spill] sm:$0xff] }
  0xeb   :  { %v506_v6 = vmax.f32 %v503_v40, %v504_v62  ;;  %v633_v33 = vmax.f32 %v629_v31, %v2190_v63  ;;  %v628_v8 = vmax.f32 %v2162_v0, %v616_v52  ;;  %vm727_vm0 = vcmp.eq.s32.totalorder %v681_v5, 1  ;;  %v2286_v0 = vld [vmem:[%s2428_s1 + $0x68] sm:$0xff]  ;;  %v696_v28 = vpop.permute.xlu1 %695 }
  0xec   :  { %v620_v51 = vsel %vm604_vm13, %v2083_v36, -inf  ;;  %v374_v21 = vmax.f32 %v372_v23, %v373_v24  ;;  %v624_v34 = vsel %vm608_vm11, %v2226_v53, -inf  ;;  %v744_v58 = vsel %vm728_vm15, %v2469_v27, -inf  ;;  %v693_v1 = vpop.permute.xlu0 %692 }
  0xed   :  { %v507_v17 = vmax.f32 %v505_v13, %v506_v6  ;;  %v637_v57 = vmax.f32 %v633_v33, %v625_v22  ;;  %v632_v29 = vmax.f32 %v628_v8, %v620_v51  ;;  %vm1059_vm5 = vcmp.eq.s32.totalorder %v2286_v0, 6 }
  0xee   :  { %v375_v63 = vrot.slane %v374_v21, 4  ;;  %v743_v12 = vsel %vm727_vm0, %v2470_v59, -inf  ;;  %vm730_vm6 = vcmp.eq.s32.totalorder %v690_v45, 1  ;;  %vm729_vm3 = vcmp.eq.s32.totalorder %v687_v2, 1  ;;  %1109 = vperm.xlu0 %1421, %v2472_v18   ;;  %1239 = vperm.xlu1 %1422, %v2475_v56  }
  0xef   :  { %v508_v9 = vrot.slane %v507_v17, 4  ;;  %v636_v26 = vmax.f32 %v632_v29, %v624_v34  ;;  %vm732_vm14 = vcmp.eq.s32.totalorder %v696_v28, 1  ;;  %vm731_vm12 = vcmp.eq.s32.totalorder %v693_v1, 1  ;;  %v702_v5 = vpop.permute.xlu1 %701 }
  0xf0   :  { %v376_v3 = vmax.f32 %v374_v21, %v375_v63  ;;  %v748_v10 = vsel %vm732_vm14, %v2119_v19, -inf  ;;  %v747_v11 = vsel %vm731_vm12, %v2155_v25, -inf  ;;  %v2473_v23 = vmov 0   ;;  %v699_v30 = vpop.permute.xlu0 %698  ;;  %v2478_v21 = vld [vmem:[#allocation13_spill] sm:$0xff] }
  0xf1   :  { %v509_v38 = vmax.f32 %v507_v17, %v508_v9  ;;  %v639_v43 = vmax.f32 %v636_v26, %v637_v57  ;;  %v760_v60 = vmax.f32 %v744_v58, %v748_v10  ;;  %v759_v7 = vmax.f32 %v743_v12, %v747_v11  ;;  %v1427_v57 = vld [vmem:[%s2428_s1 + $0x78] sm:$0xff]  ;;  %v1428_v9 = vld [vmem:[%s2428_s1 + $0x70] sm:$0xff] }
  0xf2   :  { %v1206_v46 = vsel %vm1190_vm1, 1, %v2473_v23  ;;  %v377_v54 = vrot.slane %v376_v3, 2  ;;  %v746_v44 = vsel %vm730_vm6, %v2474_v37, -inf  ;;  %v1205_v50 = vsel %vm1189_vm8, 1, %v2473_v23  ;;  %1236 = vperm.xlu0 %1421, %v2476_v42  }
  0xf3   :  { %v510_v39 = vrot.slane %v509_v38, 2  ;;  %v640_v15 = vmax.f32 %v638_v35, %v639_v43  ;;  %v745_v40 = vsel %vm729_vm3, %v2081_v14, -inf  ;;  %vm734_vm9 = vcmp.eq.s32.totalorder %v702_v5, 1  ;;  %v708_v35 = vpop.permute.xlu1 %707  ;;  %1245 = vperm.xlu1 %1422, %v1206_v46  }
  0xf4   :  { %vm733_vm13 = vcmp.eq.s32.totalorder %v699_v30, 1  ;;  %v750_v62 = vsel %vm734_vm9, %v2183_v47, -inf  ;;  %v378_v13 = vmax.f32 %v376_v3, %v377_v54  ;;  %vm1058_vm4 = vcmp.eq.s32.totalorder %v1426_v48, 6  ;;  %v705_v52 = vpop.permute.xlu0 %704 }
  0xf5   :  { %v749_v49 = vsel %vm733_vm13, %v2216_v20, -inf  ;;  %v511_v31 = vmax.f32 %v509_v38, %v510_v39  ;;  %v641_v24 = vrot.slane %v640_v15, 4  ;;  %v762_v6 = vmax.f32 %v746_v44, %v750_v62 }
  0xf6   :  { %v761_v22 = vmax.f32 %v745_v40, %v749_v49  ;;  %v379_v45 = vrot.slane %v378_v13, 1  ;;  %vm736_vm10 = vcmp.eq.s32.totalorder %v708_v35, 1  ;;  %vm735_vm7 = vcmp.eq.s32.totalorder %v705_v52, 1  ;;  %1242 = vperm.xlu0 %1421, %v1205_v50  }
  0xf7   :  { %v512_v2 = vrot.slane %v511_v31, 1  ;;  %v642_v33 = vmax.f32 %v640_v15, %v641_v24  ;;  %v1075_v8 = vsel %vm1059_vm5, 1, %v2473_v23  ;;  %v752_v51 = vsel %vm736_vm10, %v2477_v55, -inf  ;;  %v714_v12 = vpop.permute.xlu1 %713 }
  0xf8   :  { %v751_v17 = vsel %vm735_vm7, %v2478_v21, -inf  ;;  %v1074_v34 = vsel %vm1058_vm4, 1, %v2473_v23  ;;  %vm1061_vm1 = vcmp.eq.s32.totalorder %v1427_v57, 6  ;;  %v764_v58 = vmax.f32 %v760_v60, %v752_v51  ;;  %v711_v28 = vpop.permute.xlu0 %710  ;;  %1118 = vperm.xlu1 %1422, %v1075_v8  }
  0xf9   :  { %v643_v29 = vrot.slane %v642_v33, 2  ;;  %v763_v63 = vmax.f32 %v759_v7, %v751_v17  ;;  %vm1060_vm2 = vcmp.eq.s32.totalorder %v1428_v9, 6  ;;  %v380_v1 = vmax.f32 %v378_v13, %v379_v45 }
  0xfa   :  { %v513_v61 = vmax.f32 %v511_v31, %v512_v2  ;;  %vm1312_vm8 = vcmask 1040384   ;;  %vm738_vm11 = vcmp.eq.s32.totalorder %v714_v12, 1  ;;  %vm737_vm15 = vcmp.eq.s32.totalorder %v711_v28, 1  ;;  %1115 = vperm.xlu0 %1421, %v1074_v34  }
  0xfb   :  { %v644_v26 = vmax.f32 %v642_v33, %v643_v29  ;;  %v1077_v18 = vsel %vm1061_vm1, 1, %v2473_v23  ;;  %v754_v3 = vsel %vm738_vm11, %v2047_v4, -inf  ;;  %v753_v38 = vsel %vm737_vm15, %v2083_v36, -inf  ;;  %v720_v7 = vpop.permute.xlu1 %719 }
  0xfc   :  { %v1076_v10 = vsel %vm1060_vm2, 1, %v2473_v23  ;;  %vm1192_vm0 = vcmp.eq.s32.totalorder %v2286_v0, 7  ;;  %v766_v43 = vmax.f32 %v762_v6, %v754_v3  ;;  %v765_v60 = vmax.f32 %v761_v22, %v753_v38  ;;  %v717_v46 = vpop.permute.xlu0 %716  ;;  %1124 = vperm.xlu1 %1422, %v1077_v18  }
  0xfd   :  { %v645_v11 = vrot.slane %v644_v26, 1  ;;  %vm1191_vm5 = vcmp.eq.s32.totalorder %v1426_v48, 7  ;;  %v1313_v54 = vsel %vm1312_vm8, %v380_v1, %v513_v61  ;;  %vm1314_vm6 = vcmask 1041408  }
  0xfe   :  { %vm740_vm3 = vcmp.eq.s32.totalorder %v720_v7, 1  ;;  %vm739_vm14 = vcmp.eq.s32.totalorder %v717_v46, 1  ;;  %1121 = vperm.xlu0 %1421, %v1076_v10   ;;  %v1208_v44 = vsel %vm1192_vm0, 1, %v2473_v23  ;;  %v1207_v30 = vsel %vm1191_vm5, 1, %v2473_v23 }
  0xff   :  { %v646_v39 = vmax.f32 %v644_v26, %v645_v11  ;;  %v756_v5 = vsel %vm740_vm3, %v2121_v32, -inf  ;;  %v755_v0 = vsel %vm739_vm14, %v2157_v41, -inf  ;;  %vm1194_vm12 = vcmp.eq.s32.totalorder %v1427_v57, 7  ;;  %v726_v40 = vpop.permute.xlu1 %725 }
 0x100   :  { %v768_v56 = vmax.f32 %v764_v58, %v756_v5  ;;  %v767_v50 = vmax.f32 %v763_v63, %v755_v0  ;;  %vm1193_vm9 = vcmp.eq.s32.totalorder %v1428_v9, 7  ;;  %v723_v42 = vpop.permute.xlu0 %722  ;;  %1251 = vperm.xlu1 %1422, %v1208_v44   ;;  %vm742_vm13 = vcmp.eq.s32.totalorder %v726_v40, 1 }
 0x101   :  { %v1315_v15 = vsel %vm1314_vm6, %v1313_v54, %v646_v39  ;;  %vm741_vm4 = vcmp.eq.s32.totalorder %v723_v42, 1  ;;  %v1210_v49 = vsel %vm1194_vm12, 1, %v2473_v23  ;;  %v758_v13 = vsel %vm742_vm13, %v2185_v16, -inf }
 0x102   :  { %v771_v62 = vmax.f32 %v767_v50, %v768_v56  ;;  %1248 = vperm.xlu0 %1421, %v1207_v30   ;;  %v757_v31 = vsel %vm741_vm4, %v2226_v53, -inf  ;;  %v1209_v24 = vsel %vm1193_vm9, 1, %v2473_v23  ;;  %v770_v6 = vmax.f32 %v766_v43, %v758_v13 }
 0x103   :  { %v769_v22 = vmax.f32 %v765_v60, %v757_v31  ;;  %v817_v48 = vpop.permute.xlu1 %816  ;;  %vm1316_vm5 = vcmask 1042432  }
 0x104   :  { %v814_v35 = vpop.permute.xlu0 %813  ;;  %1257 = vperm.xlu1 %1422, %v1210_v49   ;;  %vm861_vm10 = vcmp.eq.s32.totalorder %v817_v48, 1 }
 0x105   :  { %v772_v52 = vmax.f32 %v769_v22, %v770_v6  ;;  %vm860_vm7 = vcmp.eq.s32.totalorder %v814_v35, 1  ;;  %v877_v29 = vsel %vm861_vm10, %v2469_v27, -inf }
 0x106   :  { %1254 = vperm.xlu0 %1421, %v1209_v24   ;;  %v876_v23 = vsel %vm860_vm7, %v2470_v59, -inf }
 0x107   :  { %v773_v45 = vmax.f32 %v771_v62, %v772_v52  ;;  %v823_v2 = vpop.permute.xlu1 %822 }
 0x108   :  { %v820_v33 = vpop.permute.xlu0 %819  ;;  %vm863_vm8 = vcmp.eq.s32.totalorder %v823_v2, 1 }
 0x109   :  { %v774_v8 = vrot.slane %v773_v45, 4  ;;  %vm862_vm11 = vcmp.eq.s32.totalorder %v820_v33, 1  ;;  %v879_v18 = vsel %vm863_vm8, %v2474_v37, -inf }
 0x10a   :  { %v878_v3 = vsel %vm862_vm11, %v2081_v14, -inf }
 0x10b   :  { %v775_v51 = vmax.f32 %v773_v45, %v774_v8  ;;  %v829_v17 = vpop.permute.xlu1 %828 }
 0x10c   :  { %v826_v34 = vpop.permute.xlu0 %825  ;;  %vm865_vm1 = vcmp.eq.s32.totalorder %v829_v17, 1 }
 0x10d   :  { %v776_v57 = vrot.slane %v775_v51, 2  ;;  %vm864_vm2 = vcmp.eq.s32.totalorder %v826_v34, 1  ;;  %v881_v58 = vsel %vm865_vm1, %v2119_v19, -inf }
 0x10e   :  { %v880_v63 = vsel %vm864_vm2, %v2155_v25, -inf  ;;  %v893_v12 = vmax.f32 %v877_v29, %v881_v58 }
 0x10f   :  { %v777_v9 = vmax.f32 %v775_v51, %v776_v57  ;;  %v892_v28 = vmax.f32 %v876_v23, %v880_v63  ;;  %v835_v1 = vpop.permute.xlu1 %834 }
 0x110   :  { %v832_v61 = vpop.permute.xlu0 %831  ;;  %vm867_vm15 = vcmp.eq.s32.totalorder %v835_v1, 1 }
 0x111   :  { %v778_v26 = vrot.slane %v777_v9, 1  ;;  %vm866_vm0 = vcmp.eq.s32.totalorder %v832_v61, 1  ;;  %v883_v38 = vsel %vm867_vm15, %v2183_v47, -inf }
 0x112   :  { %v882_v10 = vsel %vm866_vm0, %v2216_v20, -inf  ;;  %v895_v43 = vmax.f32 %v879_v18, %v883_v38 }
 0x113   :  { %v779_v11 = vmax.f32 %v777_v9, %v778_v26  ;;  %v894_v60 = vmax.f32 %v878_v3, %v882_v10  ;;  %v841_v7 = vpop.permute.xlu1 %840 }
 0x114   :  { %v838_v46 = vpop.permute.xlu0 %837  ;;  %vm869_vm6 = vcmp.eq.s32.totalorder %v841_v7, 1 }
 0x115   :  { %vm868_vm3 = vcmp.eq.s32.totalorder %v838_v46, 1  ;;  %v2344_v54 = vsel %vm1316_vm5, %v1315_v15, %v779_v11  ;;  %v885_v39 = vsel %vm869_vm6, %v2477_v55, -inf  ;;  %vm1318_vm6 = vcmask 1043456  }
 0x116   :  { %v884_v44 = vsel %vm868_vm3, %v2478_v21, -inf  ;;  %v897_v5 = vmax.f32 %v893_v12, %v885_v39 }
 0x117   :  { %v896_v0 = vmax.f32 %v892_v28, %v884_v44  ;;  %v847_v30 = vpop.permute.xlu1 %846 }
 0x118   :  { %v844_v56 = vpop.permute.xlu0 %843  ;;  %vm871_vm14 = vcmp.eq.s32.totalorder %v847_v30, 1 }
 0x119   :  { %vm870_vm12 = vcmp.eq.s32.totalorder %v844_v56, 1  ;;  %v887_v50 = vsel %vm871_vm14, %v2047_v4, -inf }
 0x11a   :  { %v886_v40 = vsel %vm870_vm12, %v2083_v36, -inf  ;;  %v899_v42 = vmax.f32 %v895_v43, %v887_v50 }
 0x11b   :  { %v898_v62 = vmax.f32 %v894_v60, %v886_v40  ;;  %v853_v49 = vpop.permute.xlu1 %852 }
 0x11c   :  { %v850_v13 = vpop.permute.xlu0 %849  ;;  %vm873_vm9 = vcmp.eq.s32.totalorder %v853_v49, 1 }
 0x11d   :  { %vm872_vm13 = vcmp.eq.s32.totalorder %v850_v13, 1  ;;  %v889_v15 = vsel %vm873_vm9, %v2121_v32, -inf }
 0x11e   :  { %v888_v31 = vsel %vm872_vm13, %v2157_v41, -inf  ;;  %v901_v24 = vmax.f32 %v897_v5, %v889_v15 }
 0x11f   :  { %v900_v6 = vmax.f32 %v896_v0, %v888_v31  ;;  %v859_v22 = vpop.permute.xlu1 %858 }
 0x120   :  { %v856_v48 = vpop.permute.xlu0 %855  ;;  %vm875_vm4 = vcmp.eq.s32.totalorder %v859_v22, 1 }
 0x121   :  { %v904_v35 = vmax.f32 %v900_v6, %v901_v24  ;;  %vm874_vm10 = vcmp.eq.s32.totalorder %v856_v48, 1  ;;  %v891_v52 = vsel %vm875_vm4, %v2185_v16, -inf }
 0x122   :  { %v890_v45 = vsel %vm874_vm10, %v2226_v53, -inf  ;;  %v903_v2 = vmax.f32 %v899_v42, %v891_v52 }
 0x123   :  { %v902_v33 = vmax.f32 %v898_v62, %v890_v45  ;;  %v950_v8 = vpop.permute.xlu1 %949 }
 0x124   :  { %v947_v51 = vpop.permute.xlu0 %946  ;;  %vm994_vm7 = vcmp.eq.s32.totalorder %v950_v8, 1 }
 0x125   :  { %v905_v17 = vmax.f32 %v902_v33, %v903_v2  ;;  %vm993_vm1 = vcmp.eq.s32.totalorder %v947_v51, 1  ;;  %v1010_v28 = vsel %vm994_vm7, %v2469_v27, -inf }
 0x126   :  { %v1009_v1 = vsel %vm993_vm1, %v2470_v59, -inf  ;;  %vm1320_vm1 = vcmask 1044480  }
 0x127   :  { %v906_v34 = vmax.f32 %v904_v35, %v905_v17  ;;  %v956_v57 = vpop.permute.xlu1 %955 }
 0x128   :  { %v953_v29 = vpop.permute.xlu0 %952  ;;  %vm996_vm11 = vcmp.eq.s32.totalorder %v956_v57, 1 }
 0x129   :  { %v907_v23 = vrot.slane %v906_v34, 4  ;;  %vm995_vm15 = vcmp.eq.s32.totalorder %v953_v29, 1  ;;  %v1012_v60 = vsel %vm996_vm11, %v2474_v37, -inf }
 0x12a   :  { %v1011_v7 = vsel %vm995_vm15, %v2081_v14, -inf }
 0x12b   :  { %v908_v58 = vmax.f32 %v906_v34, %v907_v23  ;;  %v962_v63 = vpop.permute.xlu1 %961 }
 0x12c   :  { %v959_v9 = vpop.permute.xlu0 %958  ;;  %vm998_vm2 = vcmp.eq.s32.totalorder %v962_v63, 1 }
 0x12d   :  { %v909_v12 = vrot.slane %v908_v58, 2  ;;  %vm997_vm8 = vcmp.eq.s32.totalorder %v959_v9, 1  ;;  %v1014_v61 = vsel %vm998_vm2, %v2119_v19, -inf }
 0x12e   :  { %v1013_v26 = vsel %vm997_vm8, %v2155_v25, -inf  ;;  %v1026_v3 = vmax.f32 %v1010_v28, %v1014_v61 }
 0x12f   :  { %v910_v18 = vmax.f32 %v908_v58, %v909_v12  ;;  %v1025_v38 = vmax.f32 %v1009_v1, %v1013_v26  ;;  %v968_v10 = vpop.permute.xlu1 %967 }
 0x130   :  { %v965_v11 = vpop.permute.xlu0 %964  ;;  %vm1000_vm0 = vcmp.eq.s32.totalorder %v968_v10, 1 }
 0x131   :  { %v911_v43 = vrot.slane %v910_v18, 1  ;;  %vm999_vm5 = vcmp.eq.s32.totalorder %v965_v11, 1  ;;  %v1016_v46 = vsel %vm1000_vm0, %v2183_v47, -inf }
 0x132   :  { %v1015_v39 = vsel %vm999_vm5, %v2216_v20, -inf  ;;  %v1028_v5 = vmax.f32 %v1012_v60, %v1016_v46 }
 0x133   :  { %v912_v44 = vmax.f32 %v910_v18, %v911_v43  ;;  %v1027_v0 = vmax.f32 %v1011_v7, %v1015_v39  ;;  %v974_v30 = vpop.permute.xlu1 %973 }
 0x134   :  { %v971_v56 = vpop.permute.xlu0 %970  ;;  %vm1002_vm3 = vcmp.eq.s32.totalorder %v974_v30, 1 }
 0x135   :  { %vm1001_vm14 = vcmp.eq.s32.totalorder %v971_v56, 1  ;;  %v1319_v50 = vsel %vm1318_vm6, %v2344_v54, %v912_v44  ;;  %v1018_v40 = vsel %vm1002_vm3, %v2477_v55, -inf }
 0x136   :  { %v1017_v42 = vsel %vm1001_vm14, %v2478_v21, -inf  ;;  %v1030_v62 = vmax.f32 %v1026_v3, %v1018_v40 }
 0x137   :  { %v1029_v49 = vmax.f32 %v1025_v38, %v1017_v42  ;;  %v980_v13 = vpop.permute.xlu1 %979 }
 0x138   :  { %v977_v15 = vpop.permute.xlu0 %976  ;;  %vm1004_vm12 = vcmp.eq.s32.totalorder %v980_v13, 1 }
 0x139   :  { %vm1003_vm9 = vcmp.eq.s32.totalorder %v977_v15, 1  ;;  %v1020_v31 = vsel %vm1004_vm12, %v2047_v4, -inf }
 0x13a   :  { %v1019_v24 = vsel %vm1003_vm9, %v2083_v36, -inf  ;;  %v1032_v6 = vmax.f32 %v1028_v5, %v1020_v31 }
 0x13b   :  { %v1031_v22 = vmax.f32 %v1027_v0, %v1019_v24  ;;  %v986_v48 = vpop.permute.xlu1 %985 }
 0x13c   :  { %v983_v35 = vpop.permute.xlu0 %982  ;;  %vm1006_vm13 = vcmp.eq.s32.totalorder %v986_v48, 1 }
 0x13d   :  { %vm1005_vm4 = vcmp.eq.s32.totalorder %v983_v35, 1  ;;  %v1022_v54 = vsel %vm1006_vm13, %v2121_v32, -inf }
 0x13e   :  { %v1021_v52 = vsel %vm1005_vm4, %v2157_v41, -inf  ;;  %v1034_v45 = vmax.f32 %v1030_v62, %v1022_v54 }
 0x13f   :  { %v1033_v2 = vmax.f32 %v1029_v49, %v1021_v52  ;;  %v992_v33 = vpop.permute.xlu1 %991 }
 0x140   :  { %v989_v8 = vpop.permute.xlu0 %988  ;;  %vm1008_vm10 = vcmp.eq.s32.totalorder %v992_v33, 1 }
 0x141   :  { %v1037_v51 = vmax.f32 %v1033_v2, %v1034_v45  ;;  %vm1007_vm7 = vcmp.eq.s32.totalorder %v989_v8, 1  ;;  %v1024_v17 = vsel %vm1008_vm10, %v2185_v16, -inf }
 0x142   :  { %v1023_v34 = vsel %vm1007_vm7, %v2226_v53, -inf  ;;  %v1036_v57 = vmax.f32 %v1032_v6, %v1024_v17 }
 0x143   :  { %v1035_v29 = vmax.f32 %v1031_v22, %v1023_v34  ;;  %v1083_v23 = vpop.permute.xlu1 %1082 }
 0x144   :  { %v1080_v58 = vpop.permute.xlu0 %1079  ;;  %vm1127_vm11 = vcmp.eq.s32.totalorder %v1083_v23, 1 }
 0x145   :  { %v1038_v63 = vmax.f32 %v1035_v29, %v1036_v57  ;;  %vm1126_vm15 = vcmp.eq.s32.totalorder %v1080_v58, 1  ;;  %v1143_v6 = vsel %vm1127_vm11, %v2469_v27, -inf }
 0x146   :  { %v1142_v22 = vsel %vm1126_vm15, %v2470_v59, -inf }
 0x147   :  { %v1039_v9 = vmax.f32 %v1037_v51, %v1038_v63  ;;  %v1089_v12 = vpop.permute.xlu1 %1088 }
 0x148   :  { %v1086_v28 = vpop.permute.xlu0 %1085  ;;  %vm1129_vm5 = vcmp.eq.s32.totalorder %v1089_v12, 1 }
 0x149   :  { %v1040_v1 = vrot.slane %v1039_v9, 4  ;;  %vm1128_vm6 = vcmp.eq.s32.totalorder %v1086_v28, 1  ;;  %v1145_v35 = vsel %vm1129_vm5, %v2474_v37, -inf }
 0x14a   :  { %v1144_v54 = vsel %vm1128_vm6, %v2081_v14, -inf }
 0x14b   :  { %v1041_v61 = vmax.f32 %v1039_v9, %v1040_v1  ;;  %v1095_v26 = vpop.permute.xlu1 %1094 }
 0x14c   :  { %v1092_v18 = vpop.permute.xlu0 %1091  ;;  %vm1131_vm2 = vcmp.eq.s32.totalorder %v1095_v26, 1 }
 0x14d   :  { %v1042_v3 = vrot.slane %v1041_v61, 2  ;;  %vm1130_vm8 = vcmp.eq.s32.totalorder %v1092_v18, 1  ;;  %v1147_v31 = vsel %vm1131_vm2, %v2119_v19, -inf }
 0x14e   :  { %v1146_v24 = vsel %vm1130_vm8, %v2155_v25, -inf  ;;  %v1159_v2 = vmax.f32 %v1143_v6, %v1147_v31 }
 0x14f   :  { %v1043_v38 = vmax.f32 %v1041_v61, %v1042_v3  ;;  %v1101_v10 = vpop.permute.xlu1 %1100  ;;  %v1158_v33 = vmax.f32 %v1142_v22, %v1146_v24 }
 0x150   :  { %v1098_v11 = vpop.permute.xlu0 %1097  ;;  %vm1133_vm0 = vcmp.eq.s32.totalorder %v1101_v10, 1 }
 0x151   :  { %v1044_v43 = vrot.slane %v1043_v38, 1  ;;  %vm1132_vm3 = vcmp.eq.s32.totalorder %v1098_v11, 1  ;;  %v1149_v48 = vsel %vm1133_vm0, %v2183_v47, -inf }
 0x152   :  { %v1148_v52 = vsel %vm1132_vm3, %v2216_v20, -inf  ;;  %v1161_v34 = vmax.f32 %v1145_v35, %v1149_v48 }
 0x153   :  { %v1045_v60 = vmax.f32 %v1043_v38, %v1044_v43  ;;  %v1107_v7 = vpop.permute.xlu1 %1106  ;;  %v1160_v57 = vmax.f32 %v1144_v54, %v1148_v52 }
 0x154   :  { %v1104_v46 = vpop.permute.xlu0 %1103  ;;  %vm1135_vm14 = vcmp.eq.s32.totalorder %v1107_v7, 1 }
 0x155   :  { %v2371_v39 = vsel %vm1320_vm1, %v1319_v50, %v1045_v60  ;;  %vm1134_vm12 = vcmp.eq.s32.totalorder %v1104_v46, 1  ;;  %v1151_v45 = vsel %vm1135_vm14, %v2477_v55, -inf }
 0x156   :  { %v1150_v8 = vsel %vm1134_vm12, %v2478_v21, -inf  ;;  %v1163_v29 = vmax.f32 %v1159_v2, %v1151_v45 }
 0x157   :  { %v1216_v44 = vpop.permute.xlu1 %1215  ;;  %v1162_v23 = vmax.f32 %v1158_v33, %v1150_v8 }
 0x158   :  { %v1213_v5 = vpop.permute.xlu0 %1212  ;;  %vm1260_vm9 = vcmp.eq.s32.totalorder %v1216_v44, 1 }
 0x159   :  { %vm1259_vm13 = vcmp.eq.s32.totalorder %v1213_v5, 1  ;;  %v1276_v58 = vsel %vm1260_vm9, %v2469_v27, -inf }
 0x15a   :  { %v1275_v63 = vsel %vm1259_vm13, %v2470_v59, -inf }
 0x15b   :  { %v1222_v0 = vpop.permute.xlu1 %1221 }
 0x15c   :  { %v1219_v30 = vpop.permute.xlu0 %1218  ;;  %vm1262_vm7 = vcmp.eq.s32.totalorder %v1222_v0, 1 }
 0x15d   :  { %vm1261_vm1 = vcmp.eq.s32.totalorder %v1219_v30, 1  ;;  %v1278_v61 = vsel %vm1262_vm7, %v2474_v37, -inf }
 0x15e   :  { %v1277_v26 = vsel %vm1261_vm1, %v2081_v14, -inf }
 0x15f   :  { %v1228_v56 = vpop.permute.xlu1 %1227 }
 0x160   :  { %v1225_v40 = vpop.permute.xlu0 %1224  ;;  %vm1264_vm2 = vcmp.eq.s32.totalorder %v1228_v56, 1 }
 0x161   :  { %vm1263_vm8 = vcmp.eq.s32.totalorder %v1225_v40, 1  ;;  %v1280_v18 = vsel %vm1264_vm2, %v2119_v19, -inf  ;;  %vm1322_vm2 = vcmask 1045504  }
 0x162   :  { %v1279_v27 = vsel %vm1263_vm8, %v2155_v25, -inf  ;;  %v1292_v43 = vmax.f32 %v1276_v58, %v1280_v18  ;;  %vm1324_vm8 = vcmask 1046528  }
 0x163   :  { %v1234_v42 = vpop.permute.xlu1 %1233  ;;  %v1291_v60 = vmax.f32 %v1275_v63, %v1279_v27 }
 0x164   :  { %vm1266_vm11 = vcmp.eq.s32.totalorder %v1234_v42, 1 }
 0x165   :  { %v2373_v62 = vpop.permute.xlu0 %1230  ;;  %v1282_v38 = vsel %vm1266_vm11, %v2183_v47, -inf }
 0x166   :  { %vm1265_vm5 = vcmp.eq.s32.totalorder %v2373_v62, 1  ;;  %v1294_v30 = vmax.f32 %v1278_v61, %v1282_v38 }
 0x167   :  { %v1113_v49 = vpop.permute.xlu1 %1112  ;;  %v1281_v46 = vsel %vm1265_vm5, %v2216_v20, -inf }
 0x168   :  { %vm1137_vm4 = vcmp.eq.s32.totalorder %v1113_v49, 1  ;;  %v1293_v20 = vmax.f32 %v1277_v26, %v1281_v46 }
 0x169   :  { %v1110_v13 = vpop.permute.xlu0 %1109  ;;  %v1153_v9 = vsel %vm1137_vm4, %v2047_v4, -inf }
 0x16a   :  { %vm1136_vm10 = vcmp.eq.s32.totalorder %v1110_v13, 1  ;;  %v1165_v10 = vmax.f32 %v1161_v34, %v1153_v9 }
 0x16b   :  { %v2375_v50 = vpop.permute.xlu1 %1239  ;;  %v1152_v12 = vsel %vm1136_vm10, %v2083_v36, -inf }
 0x16c   :  { %v1164_v11 = vmax.f32 %v1160_v57, %v1152_v12  ;;  %vm1268_vm6 = vcmp.eq.s32.totalorder %v2375_v50, 1 }
 0x16d   :  { %v2377_v15 = vpop.permute.xlu0 %1236  ;;  %v1284_v44 = vsel %vm1268_vm6, %v2477_v55, -inf }
 0x16e   :  { %vm1267_vm3 = vcmp.eq.s32.totalorder %v2377_v15, 1  ;;  %v1296_v55 = vmax.f32 %v1292_v43, %v1284_v44 }
 0x16f   :  { %v1246_v51 = vpop.permute.xlu1 %1245  ;;  %v1283_v56 = vsel %vm1267_vm3, %v2478_v21, -inf }
 0x170   :  { %vm1270_vm14 = vcmp.eq.s32.totalorder %v1246_v51, 1  ;;  %v1295_v15 = vmax.f32 %v1291_v60, %v1283_v56 }
 0x171   :  { %v1243_v17 = vpop.permute.xlu0 %1242  ;;  %v1286_v40 = vsel %vm1270_vm14, %v2047_v4, -inf }
 0x172   :  { %vm1269_vm12 = vcmp.eq.s32.totalorder %v1243_v17, 1  ;;  %v1298_v6 = vmax.f32 %v1294_v30, %v1286_v40 }
 0x173   :  { %v1119_v28 = vpop.permute.xlu1 %1118  ;;  %v1285_v42 = vsel %vm1269_vm12, %v2083_v36, -inf }
 0x174   :  { %vm1139_vm15 = vcmp.eq.s32.totalorder %v1119_v28, 1  ;;  %v1297_v22 = vmax.f32 %v1293_v20, %v1285_v42 }
 0x175   :  { %v1116_v1 = vpop.permute.xlu0 %1115  ;;  %v1155_v3 = vsel %vm1139_vm15, %v2121_v32, -inf }
 0x176   :  { %vm1138_vm0 = vcmp.eq.s32.totalorder %v1116_v1, 1  ;;  %v1167_v37 = vmax.f32 %v1163_v29, %v1155_v3 }
 0x177   :  { %v1154_v59 = vsel %vm1138_vm0, %v2157_v41, -inf  ;;  %v1125_v14 = vpop.permute.xlu1 %1124 }
 0x178   :  { %v1166_v25 = vmax.f32 %v1162_v23, %v1154_v59  ;;  %vm1141_vm9 = vcmp.eq.s32.totalorder %v1125_v14, 1 }
 0x179   :  { %v1122_v19 = vpop.permute.xlu0 %1121  ;;  %v1157_v47 = vsel %vm1141_vm9, %v2185_v16, -inf }
 0x17a   :  { %vm1140_vm13 = vcmp.eq.s32.totalorder %v1122_v19, 1  ;;  %v1169_v5 = vmax.f32 %v1165_v10, %v1157_v47  ;;  %v1170_v50 = vmax.f32 %v1166_v25, %v1167_v37 }
 0x17b   :  { %v1156_v7 = vsel %vm1140_vm13, %v2226_v53, -inf  ;;  %v1252_v49 = vpop.permute.xlu1 %1251 }
 0x17c   :  { %v1168_v0 = vmax.f32 %v1164_v11, %v1156_v7  ;;  %vm1272_vm4 = vcmp.eq.s32.totalorder %v1252_v49, 1 }
 0x17d   :  { %v1249_v13 = vpop.permute.xlu0 %1248  ;;  %v1288_v31 = vsel %vm1272_vm4, %v2121_v32, -inf }
 0x17e   :  { %v1171_v62 = vmax.f32 %v1168_v0, %v1169_v5  ;;  %vm1271_vm10 = vcmp.eq.s32.totalorder %v1249_v13, 1  ;;  %v1300_v4 = vmax.f32 %v1296_v55, %v1288_v31 }
 0x17f   :  { %v1287_v24 = vsel %vm1271_vm10, %v2157_v41, -inf  ;;  %v1258_v48 = vpop.permute.xlu1 %1257 }
 0x180   :  { %v1172_v21 = vmax.f32 %v1170_v50, %v1171_v62  ;;  %v1299_v54 = vmax.f32 %v1295_v15, %v1287_v24  ;;  %vm1274_vm7 = vcmp.eq.s32.totalorder %v1258_v48, 1 }
 0x181   :  { %v1255_v35 = vpop.permute.xlu0 %1254  ;;  %v1290_v52 = vsel %vm1274_vm7, %v2185_v16, -inf }
 0x182   :  { %v1173_v36 = vrot.slane %v1172_v21, 4  ;;  %vm1273_vm1 = vcmp.eq.s32.totalorder %v1255_v35, 1  ;;  %v1302_v33 = vmax.f32 %v1298_v6, %v1290_v52  ;;  %v1303_v41 = vmax.f32 %v1299_v54, %v1300_v4 }
 0x183   :  { %v1289_v45 = vsel %vm1273_vm1, %v2226_v53, -inf  ;;  %v1326_v53 = vld [vmem:[%s2429_s2] sm:$0xff] }
 0x184   :  { %v1174_v2 = vmax.f32 %v1172_v21, %v1173_v36  ;;  %v1301_v32 = vmax.f32 %v1297_v22, %v1289_v45 }
 0x186   :  { %v1175_v8 = vrot.slane %v1174_v2, 2  ;;  %v1304_v51 = vmax.f32 %v1301_v32, %v1302_v33 }
 0x188   :  { %v1305_v17 = vmax.f32 %v1303_v41, %v1304_v51  ;;  %v1176_v34 = vmax.f32 %v1174_v2, %v1175_v8 }
 0x18a   :  { %v1306_v57 = vrot.slane %v1305_v17, 4  ;;  %v1177_v23 = vrot.slane %v1176_v34, 1 }
 0x18c   :  { %v1307_v29 = vmax.f32 %v1305_v17, %v1306_v57  ;;  %v1178_v9 = vmax.f32 %v1176_v34, %v1177_v23 }
 0x18e   :  { %v1308_v58 = vrot.slane %v1307_v29, 2  ;;  %v1323_v28 = vsel %vm1322_vm2, %v2371_v39, %v1178_v9 }
 0x190   :  { %v1309_v63 = vmax.f32 %v1307_v29, %v1308_v58 }
 0x192   :  { %v1310_v12 = vrot.slane %v1309_v63, 1 }
 0x194   :  { %v1311_v16 = vmax.f32 %v1309_v63, %v1310_v12 }
 0x196   :  { %v1325_v1 = vsel %vm1324_vm8, %v1323_v28, %v1311_v16 }
 0x197   :  { %v1327_v61 = vmax.f32 %v1325_v1, %v1326_v53 }
 0x199   :  { %1328 = vst [vmem:[#allocation2] sm:$0xff] %v1327_v61 }
 0x19a   :  { %1440 = shalt.err (!%p1437_p4)
}
 0x19b   :  { %1338 = dma.vmem_to_hbm [thread:$0]  %s1336_s19, 128, %s2431_s4, [#allocation3]  }
 0x19c   :  { %1449 = dma.done.wait [#allocation3], 128  }
 0x19d   :  { %1450 = vsyncadd [#allocation3], 4294967168 }
 0x19e   :  { %1342 = vsyncpa [#allocation3], 1 }

</bundles_post_ra>
